<compile_context>
chip_gen: v6e
topology: v6e:2x2x1
jax: 0.10.0
libtpu: 0.0.40
codegen_flags: <defaults>
</compile_context>

<pallas_src>
import jax
import jax.numpy as jnp
from jax import lax
from jax.experimental import pallas as pl
from jax.experimental.pallas import tpu as pltpu

BN_EPS = 1e-5
LEAK = 0.2
P = 16          # 4x4 spatial positions
KH = KW = 4     # feature-map height/width


# ------------------------------ kernel helpers --------------------------------
def _col_to_row(col):
    """Layout-safe (N, 1) -> (1, N) move (batch from sublanes to lanes).

    Implemented with 2-D iota + select + sublane reduce so it lowers with plain
    VPU/XLU ops (no reshape/transpose that would need an exotic relayout)."""
    n = col.shape[0]
    r = lax.broadcasted_iota(jnp.int32, (n, n), 0)
    c = lax.broadcasted_iota(jnp.int32, (n, n), 1)
    return jnp.sum(jnp.where(r == c, col, 0.0), axis=0, keepdims=True)


def _outlogits_sigmoid(h3, w2, b2):
    """outlogits Conv2d(ndf8, 1, k=4, s=4) + bias + sigmoid.

    h3: (TB, 16, ndf8), w2: (16, ndf8) broadcast over batch, b2: (1, 1).
    Returns lane-dense (1, TB)."""
    prod = h3 * w2                                   # (TB, 16, ndf8)  VPU
    s = jnp.sum(prod, axis=2, keepdims=True)         # (TB, 16, 1)     lane reduce (XLU)
    col = jnp.sum(s, axis=1)                         # (TB, 1)         sublane reduce
    col = jax.nn.sigmoid(col + b2)                   # (TB, 1)         EUP
    return _col_to_row(col)                          # (1, TB)


# ---------------------------------- kernels ------------------------------------
def _d_get_logits_cond_kernel(xp_ref, w1_ref, b1_ref, w2_ref, b2_ref, out_ref):
    # xp_ref : (TB, 6, 6, Cin)   zero-padded NHWC activations (h_code ++ tiled c_code)
    # w1_ref : (9, Cin, ndf8)    3x3 conv weights with BN scale folded in
    # b1_ref : (1, ndf8)         folded BN shift
    # w2_ref : (16, ndf8)        outlogits weight rows (y*4+x ordering)
    # b2_ref : (1, 1)            outlogits bias
    # out_ref: (1, TB)
    tb = xp_ref.shape[0]
    cin = xp_ref.shape[3]
    ndf8 = w1_ref.shape[2]

    # jointConv as 9 accumulated shifted-slice matmuls (in-kernel im2col).
    acc = jnp.zeros((tb * P, ndf8), jnp.float32)
    for t in range(9):
        ky, kx = t // 3, t % 3
        x = xp_ref[:, ky:ky + KH, kx:kx + KW, :].reshape(tb * P, cin)
        acc = acc + jnp.dot(x, w1_ref[t], preferred_element_type=jnp.float32)

    # folded BatchNorm shift + LeakyReLU(0.2)
    y = acc + b1_ref[...]
    h = jnp.where(y >= 0.0, y, LEAK * y)             # (TB*16, ndf8)

    out_ref[...] = _outlogits_sigmoid(h.reshape(tb, P, ndf8), w2_ref[...], b2_ref[...])


def _d_get_logits_uncond_kernel(h_ref, w2_ref, b2_ref, out_ref):
    # h_ref: (TB, 16, ndf8) NHWC activations, w2/b2 as above, out_ref: (1, TB)
    out_ref[...] = _outlogits_sigmoid(h_ref[...], w2_ref[...], b2_ref[...])


# --------------------------- one-time parameter prep ---------------------------
def prepare_d_get_logits_params(params):
    """Fold BN into the 3x3 conv and lay out all weights once (not per call)."""
    prep = {}
    out_w = params["out_w"]                                            # (1, ndf8, 4, 4)
    ndf8 = out_w.shape[1]
    # outlogits weight rows ordered (y, x), channels on lanes.
    prep["w2"] = jnp.transpose(out_w, (0, 2, 3, 1)).reshape(P, ndf8).astype(jnp.float32)
    prep["b2"] = params["out_b"].reshape(1, 1).astype(jnp.float32)

    if "joint_w" in params:
        jw = params["joint_w"]                                         # (ndf8, Cin, 3, 3)
        cin = jw.shape[1]
        scale = params["bn_gamma"] / jnp.sqrt(params["bn_var"] + BN_EPS)   # (ndf8,)
        shift = params["bn_beta"] - params["bn_mean"] * scale
        # (O, I, ky, kx) -> (ky, kx, I, O) -> (9, Cin, ndf8), BN scale folded per O.
        w1 = jnp.transpose(jw, (2, 3, 1, 0)).reshape(9, cin, ndf8)
        prep["w1"] = (w1 * scale[None, None, :]).astype(jnp.float32)
        prep["b1"] = shift.reshape(1, ndf8).astype(jnp.float32)
    return prep


# ---------------------------------- wrapper -------------------------------------
def _batch_tile(batch):
    if batch <= 128:
        return batch
    assert batch % 128 == 0, "large batches must be a multiple of 128"
    return 128


def d_get_logits_forward(h_code, prep, c_code=None):
    """h_code: (B, ndf*8, 4, 4) NCHW.  c_code: (B, nef) or None.  prep: prepared params."""
    B, ndf8, H, W = h_code.shape
    assert H == KH and W == KW, "D_GET_LOGITS operates on a 4x4 feature map"

    tb = _batch_tile(B)
    grid = (B // tb,)
    compiler_params = pltpu.CompilerParams(dimension_semantics=("parallel",))
    out_shape = jax.ShapeDtypeStruct((1, B), jnp.float32)      # lane-dense output
    out_spec = pl.BlockSpec((1, tb), lambda i: (0, i))
    w2_spec = pl.BlockSpec((P, ndf8), lambda i: (0, 0))
    b2_spec = pl.BlockSpec((1, 1), lambda i: (0, 0))

    h_nhwc = jnp.transpose(h_code, (0, 2, 3, 1)).astype(jnp.float32)    # (B,4,4,ndf8)

    if c_code is not None:
        nef = c_code.shape[1]
        cin = ndf8 + nef
        # Layout-only prep (transpose/concat/pad); im2col itself happens in-kernel.
        c_tile = jnp.broadcast_to(c_code[:, None, None, :].astype(jnp.float32),
                                  (B, H, W, nef))
        x = jnp.concatenate([h_nhwc, c_tile], axis=-1)                  # (B,4,4,Cin)
        xp = jnp.pad(x, ((0, 0), (1, 1), (1, 1), (0, 0)))               # (B,6,6,Cin)

        out = pl.pallas_call(
            _d_get_logits_cond_kernel,
            out_shape=out_shape,
            grid=grid,
            in_specs=[
                pl.BlockSpec((tb, H + 2, W + 2, cin), lambda i: (i, 0, 0, 0)),
                pl.BlockSpec((9, cin, ndf8), lambda i: (0, 0, 0)),
                pl.BlockSpec((1, ndf8), lambda i: (0, 0)),
                w2_spec,
                b2_spec,
            ],
            out_specs=out_spec,
            compiler_params=compiler_params,
        )(xp, prep["w1"], prep["b1"], prep["w2"], prep["b2"])
    else:
        h3 = h_nhwc.reshape(B, P, ndf8)                                  # (B,16,ndf8)
        out = pl.pallas_call(
            _d_get_logits_uncond_kernel,
            out_shape=out_shape,
            grid=grid,
            in_specs=[
                pl.BlockSpec((tb, P, ndf8), lambda i: (i, 0, 0)),
                w2_spec,
                b2_spec,
            ],
            out_specs=out_spec,
            compiler_params=compiler_params,
        )(h3, prep["w2"], prep["b2"])

    return out.reshape(-1)


# --------------------------- reference (plain JAX) ------------------------------
def reference_forward(h_code, params, c_code=None):
    x = h_code
    if c_code is not None:
        B, nef = c_code.shape
        c = jnp.broadcast_to(c_code[:, :, None, None], (B, nef, 4, 4))
        x = jnp.concatenate([h_code, c], axis=1)
        y = lax.conv_general_dilated(
            x, params["joint_w"], window_strides=(1, 1), padding=((1, 1), (1, 1)),
            dimension_numbers=("NCHW", "OIHW", "NCHW"),
            precision=lax.Precision.HIGHEST)
        scale = params["bn_gamma"] / jnp.sqrt(params["bn_var"] + BN_EPS)
        shift = params["bn_beta"] - params["bn_mean"] * scale
        y = y * scale[None, :, None, None] + shift[None, :, None, None]
        x = jnp.where(y >= 0.0, y, LEAK * y)
    out = lax.conv_general_dilated(
        x, params["out_w"], window_strides=(4, 4), padding="VALID",
        dimension_numbers=("NCHW", "OIHW", "NCHW"),
        precision=lax.Precision.HIGHEST)
    out = out + params["out_b"][None, :, None, None]
    return jax.nn.sigmoid(out).reshape(-1)


# ----------------------------------- main ---------------------------------------
if __name__ == "__main__":
    B, NDF, NEF = 4, 16, 32          # ndf*8 = 128 channels -> lane-dense matmuls
    NDF8 = NDF * 8
    CIN = NDF8 + NEF

    key = jax.random.PRNGKey(0)
    ks = jax.random.split(key, 9)

    h_code = jax.random.normal(ks[0], (B, NDF8, 4, 4), jnp.float32)
    c_code = jax.random.normal(ks[1], (B, NEF), jnp.float32)

    params = dict(
        joint_w=jax.random.normal(ks[2], (NDF8, CIN, 3, 3), jnp.float32) * 0.05,
        bn_gamma=jax.random.uniform(ks[3], (NDF8,), jnp.float32, 0.5, 1.5),
        bn_beta=jax.random.normal(ks[4], (NDF8,), jnp.float32) * 0.1,
        bn_mean=jax.random.normal(ks[5], (NDF8,), jnp.float32) * 0.1,
        bn_var=jax.random.uniform(ks[6], (NDF8,), jnp.float32, 0.5, 1.5),
        out_w=jax.random.normal(ks[7], (1, NDF8, 4, 4), jnp.float32) * 0.02,
        out_b=jax.random.normal(ks[8], (1,), jnp.float32) * 0.1,
    )

    prep = prepare_d_get_logits_params(params)     # one-time: BN fold + weight layout

    out_cond = d_get_logits_forward(h_code, prep, c_code)      # bcondition=True
    out_uncond = d_get_logits_forward(h_code, prep, None)      # bcondition=False
    jax.block_until_ready((out_cond, out_uncond))

    ref_cond = reference_forward(h_code, params, c_code)
    ref_uncond = reference_forward(h_code, params, None)

    assert out_cond.shape == (B,) and out_uncond.shape == (B,)
    assert jnp.allclose(out_cond, ref_cond, atol=1e-4, rtol=1e-4), (out_cond, ref_cond)
    assert jnp.allclose(out_uncond, ref_uncond, atol=1e-4, rtol=1e-4), (out_uncond, ref_uncond)

    print("KERNEL_OK")
</pallas_src>

<mosaic_0001>
module attributes {stable_mosaic.version = 11 : i64} {
  func.func @_d_get_logits_cond_kernel(%arg0: i32, %arg1: memref<4x6x6x160xf32, #tpu.memory_space<vmem>>, %arg2: memref<9x160x128xf32, #tpu.memory_space<vmem>>, %arg3: memref<1x128xf32, #tpu.memory_space<vmem>>, %arg4: memref<16x128xf32, #tpu.memory_space<vmem>>, %arg5: memref<1x1xf32, #tpu.memory_space<vmem>>, %arg6: memref<1x4xf32, #tpu.memory_space<vmem>>) attributes {dimension_semantics = [#tpu.dimension_semantics<parallel>], iteration_bounds = array<i64: 1>, scalar_prefetch = 0 : i64, scratch_operands = 0 : i64, tpu.core_type = #tpu.core_type<tc>, window_params = [{transform_indices = @transform_0, window_bounds = array<i64: 4, 6, 6, 160>}, {pipeline_mode = #tpu.pipeline_mode<synchronous>, transform_indices = @transform_1, window_bounds = array<i64: 9, 160, 128>}, {pipeline_mode = #tpu.pipeline_mode<synchronous>, transform_indices = @transform_2, window_bounds = array<i64: 1, 128>}, {pipeline_mode = #tpu.pipeline_mode<synchronous>, transform_indices = @transform_3, window_bounds = array<i64: 16, 128>}, {pipeline_mode = #tpu.pipeline_mode<synchronous>, transform_indices = @transform_4, window_bounds = array<i64: 1, 1>}, {transform_indices = @transform_5, window_bounds = array<i64: 1, 4>}]} {
    %cst = arith.constant 0.000000e+00 : f32
    %0 = vector.broadcast %cst : f32 to vector<64x128xf32>
    %c0 = arith.constant 0 : index
    %c0_0 = arith.constant 0 : index
    %c0_1 = arith.constant 0 : index
    %c0_2 = arith.constant 0 : index
    %1 = vector.load %arg1[%c0, %c0_0, %c0_1, %c0_2] : memref<4x6x6x160xf32, #tpu.memory_space<vmem>>, vector<4x4x4x160xf32>
    %2 = vector.shape_cast %1 : vector<4x4x4x160xf32> to vector<64x160xf32>
    %c0_3 = arith.constant 0 : index
    %c0_4 = arith.constant 0 : index
    %c0_5 = arith.constant 0 : index
    %3 = vector.load %arg2[%c0_3, %c0_4, %c0_5] : memref<9x160x128xf32, #tpu.memory_space<vmem>>, vector<1x160x128xf32>
    %4 = vector.shape_cast %3 : vector<1x160x128xf32> to vector<160x128xf32>
    %cst_6 = arith.constant dense<0.000000e+00> : vector<64x128xf32>
    %5 = tpu.matmul %2, %4, %cst_6 {dimension_numbers = #tpu.dot_dimension_numbers<[1], [0], [0], [1], [0, 0, 1, 1], [], []>} : vector<64x160xf32>, vector<160x128xf32>, vector<64x128xf32> -> vector<64x128xf32>
    %6 = arith.addf %0, %5 : vector<64x128xf32>
    %c0_7 = arith.constant 0 : index
    %c0_8 = arith.constant 0 : index
    %c1 = arith.constant 1 : index
    %c0_9 = arith.constant 0 : index
    %7 = vector.load %arg1[%c0_7, %c0_8, %c1, %c0_9] : memref<4x6x6x160xf32, #tpu.memory_space<vmem>>, vector<4x4x4x160xf32>
    %8 = vector.shape_cast %7 : vector<4x4x4x160xf32> to vector<64x160xf32>
    %c1_10 = arith.constant 1 : index
    %c0_11 = arith.constant 0 : index
    %c0_12 = arith.constant 0 : index
    %9 = vector.load %arg2[%c1_10, %c0_11, %c0_12] : memref<9x160x128xf32, #tpu.memory_space<vmem>>, vector<1x160x128xf32>
    %10 = vector.shape_cast %9 : vector<1x160x128xf32> to vector<160x128xf32>
    %cst_13 = arith.constant dense<0.000000e+00> : vector<64x128xf32>
    %11 = tpu.matmul %8, %10, %cst_13 {dimension_numbers = #tpu.dot_dimension_numbers<[1], [0], [0], [1], [0, 0, 1, 1], [], []>} : vector<64x160xf32>, vector<160x128xf32>, vector<64x128xf32> -> vector<64x128xf32>
    %12 = arith.addf %6, %11 : vector<64x128xf32>
    %c0_14 = arith.constant 0 : index
    %c0_15 = arith.constant 0 : index
    %c2 = arith.constant 2 : index
    %c0_16 = arith.constant 0 : index
    %13 = vector.load %arg1[%c0_14, %c0_15, %c2, %c0_16] : memref<4x6x6x160xf32, #tpu.memory_space<vmem>>, vector<4x4x4x160xf32>
    %14 = vector.shape_cast %13 : vector<4x4x4x160xf32> to vector<64x160xf32>
    %c2_17 = arith.constant 2 : index
    %c0_18 = arith.constant 0 : index
    %c0_19 = arith.constant 0 : index
    %15 = vector.load %arg2[%c2_17, %c0_18, %c0_19] : memref<9x160x128xf32, #tpu.memory_space<vmem>>, vector<1x160x128xf32>
    %16 = vector.shape_cast %15 : vector<1x160x128xf32> to vector<160x128xf32>
    %cst_20 = arith.constant dense<0.000000e+00> : vector<64x128xf32>
    %17 = tpu.matmul %14, %16, %cst_20 {dimension_numbers = #tpu.dot_dimension_numbers<[1], [0], [0], [1], [0, 0, 1, 1], [], []>} : vector<64x160xf32>, vector<160x128xf32>, vector<64x128xf32> -> vector<64x128xf32>
    %18 = arith.addf %12, %17 : vector<64x128xf32>
    %c0_21 = arith.constant 0 : index
    %c1_22 = arith.constant 1 : index
    %c0_23 = arith.constant 0 : index
    %c0_24 = arith.constant 0 : index
    %19 = vector.load %arg1[%c0_21, %c1_22, %c0_23, %c0_24] : memref<4x6x6x160xf32, #tpu.memory_space<vmem>>, vector<4x4x4x160xf32>
    %20 = vector.shape_cast %19 : vector<4x4x4x160xf32> to vector<64x160xf32>
    %c3 = arith.constant 3 : index
    %c0_25 = arith.constant 0 : index
    %c0_26 = arith.constant 0 : index
    %21 = vector.load %arg2[%c3, %c0_25, %c0_26] : memref<9x160x128xf32, #tpu.memory_space<vmem>>, vector<1x160x128xf32>
    %22 = vector.shape_cast %21 : vector<1x160x128xf32> to vector<160x128xf32>
    %cst_27 = arith.constant dense<0.000000e+00> : vector<64x128xf32>
    %23 = tpu.matmul %20, %22, %cst_27 {dimension_numbers = #tpu.dot_dimension_numbers<[1], [0], [0], [1], [0, 0, 1, 1], [], []>} : vector<64x160xf32>, vector<160x128xf32>, vector<64x128xf32> -> vector<64x128xf32>
    %24 = arith.addf %18, %23 : vector<64x128xf32>
    %c0_28 = arith.constant 0 : index
    %c1_29 = arith.constant 1 : index
    %c1_30 = arith.constant 1 : index
    %c0_31 = arith.constant 0 : index
    %25 = vector.load %arg1[%c0_28, %c1_29, %c1_30, %c0_31] : memref<4x6x6x160xf32, #tpu.memory_space<vmem>>, vector<4x4x4x160xf32>
    %26 = vector.shape_cast %25 : vector<4x4x4x160xf32> to vector<64x160xf32>
    %c4 = arith.constant 4 : index
    %c0_32 = arith.constant 0 : index
    %c0_33 = arith.constant 0 : index
    %27 = vector.load %arg2[%c4, %c0_32, %c0_33] : memref<9x160x128xf32, #tpu.memory_space<vmem>>, vector<1x160x128xf32>
    %28 = vector.shape_cast %27 : vector<1x160x128xf32> to vector<160x128xf32>
    %cst_34 = arith.constant dense<0.000000e+00> : vector<64x128xf32>
    %29 = tpu.matmul %26, %28, %cst_34 {dimension_numbers = #tpu.dot_dimension_numbers<[1], [0], [0], [1], [0, 0, 1, 1], [], []>} : vector<64x160xf32>, vector<160x128xf32>, vector<64x128xf32> -> vector<64x128xf32>
    %30 = arith.addf %24, %29 : vector<64x128xf32>
    %c0_35 = arith.constant 0 : index
    %c1_36 = arith.constant 1 : index
    %c2_37 = arith.constant 2 : index
    %c0_38 = arith.constant 0 : index
    %31 = vector.load %arg1[%c0_35, %c1_36, %c2_37, %c0_38] : memref<4x6x6x160xf32, #tpu.memory_space<vmem>>, vector<4x4x4x160xf32>
    %32 = vector.shape_cast %31 : vector<4x4x4x160xf32> to vector<64x160xf32>
    %c5 = arith.constant 5 : index
    %c0_39 = arith.constant 0 : index
    %c0_40 = arith.constant 0 : index
    %33 = vector.load %arg2[%c5, %c0_39, %c0_40] : memref<9x160x128xf32, #tpu.memory_space<vmem>>, vector<1x160x128xf32>
    %34 = vector.shape_cast %33 : vector<1x160x128xf32> to vector<160x128xf32>
    %cst_41 = arith.constant dense<0.000000e+00> : vector<64x128xf32>
    %35 = tpu.matmul %32, %34, %cst_41 {dimension_numbers = #tpu.dot_dimension_numbers<[1], [0], [0], [1], [0, 0, 1, 1], [], []>} : vector<64x160xf32>, vector<160x128xf32>, vector<64x128xf32> -> vector<64x128xf32>
    %36 = arith.addf %30, %35 : vector<64x128xf32>
    %c0_42 = arith.constant 0 : index
    %c2_43 = arith.constant 2 : index
    %c0_44 = arith.constant 0 : index
    %c0_45 = arith.constant 0 : index
    %37 = vector.load %arg1[%c0_42, %c2_43, %c0_44, %c0_45] : memref<4x6x6x160xf32, #tpu.memory_space<vmem>>, vector<4x4x4x160xf32>
    %38 = vector.shape_cast %37 : vector<4x4x4x160xf32> to vector<64x160xf32>
    %c6 = arith.constant 6 : index
    %c0_46 = arith.constant 0 : index
    %c0_47 = arith.constant 0 : index
    %39 = vector.load %arg2[%c6, %c0_46, %c0_47] : memref<9x160x128xf32, #tpu.memory_space<vmem>>, vector<1x160x128xf32>
    %40 = vector.shape_cast %39 : vector<1x160x128xf32> to vector<160x128xf32>
    %cst_48 = arith.constant dense<0.000000e+00> : vector<64x128xf32>
    %41 = tpu.matmul %38, %40, %cst_48 {dimension_numbers = #tpu.dot_dimension_numbers<[1], [0], [0], [1], [0, 0, 1, 1], [], []>} : vector<64x160xf32>, vector<160x128xf32>, vector<64x128xf32> -> vector<64x128xf32>
    %42 = arith.addf %36, %41 : vector<64x128xf32>
    %c0_49 = arith.constant 0 : index
    %c2_50 = arith.constant 2 : index
    %c1_51 = arith.constant 1 : index
    %c0_52 = arith.constant 0 : index
    %43 = vector.load %arg1[%c0_49, %c2_50, %c1_51, %c0_52] : memref<4x6x6x160xf32, #tpu.memory_space<vmem>>, vector<4x4x4x160xf32>
    %44 = vector.shape_cast %43 : vector<4x4x4x160xf32> to vector<64x160xf32>
    %c7 = arith.constant 7 : index
    %c0_53 = arith.constant 0 : index
    %c0_54 = arith.constant 0 : index
    %45 = vector.load %arg2[%c7, %c0_53, %c0_54] : memref<9x160x128xf32, #tpu.memory_space<vmem>>, vector<1x160x128xf32>
    %46 = vector.shape_cast %45 : vector<1x160x128xf32> to vector<160x128xf32>
    %cst_55 = arith.constant dense<0.000000e+00> : vector<64x128xf32>
    %47 = tpu.matmul %44, %46, %cst_55 {dimension_numbers = #tpu.dot_dimension_numbers<[1], [0], [0], [1], [0, 0, 1, 1], [], []>} : vector<64x160xf32>, vector<160x128xf32>, vector<64x128xf32> -> vector<64x128xf32>
    %48 = arith.addf %42, %47 : vector<64x128xf32>
    %c0_56 = arith.constant 0 : index
    %c2_57 = arith.constant 2 : index
    %c2_58 = arith.constant 2 : index
    %c0_59 = arith.constant 0 : index
    %49 = vector.load %arg1[%c0_56, %c2_57, %c2_58, %c0_59] : memref<4x6x6x160xf32, #tpu.memory_space<vmem>>, vector<4x4x4x160xf32>
    %50 = vector.shape_cast %49 : vector<4x4x4x160xf32> to vector<64x160xf32>
    %c8 = arith.constant 8 : index
    %c0_60 = arith.constant 0 : index
    %c0_61 = arith.constant 0 : index
    %51 = vector.load %arg2[%c8, %c0_60, %c0_61] : memref<9x160x128xf32, #tpu.memory_space<vmem>>, vector<1x160x128xf32>
    %52 = vector.shape_cast %51 : vector<1x160x128xf32> to vector<160x128xf32>
    %cst_62 = arith.constant dense<0.000000e+00> : vector<64x128xf32>
    %53 = tpu.matmul %50, %52, %cst_62 {dimension_numbers = #tpu.dot_dimension_numbers<[1], [0], [0], [1], [0, 0, 1, 1], [], []>} : vector<64x160xf32>, vector<160x128xf32>, vector<64x128xf32> -> vector<64x128xf32>
    %54 = arith.addf %48, %53 : vector<64x128xf32>
    %c0_63 = arith.constant 0 : index
    %c0_64 = arith.constant 0 : index
    %55 = vector.load %arg3[%c0_63, %c0_64] : memref<1x128xf32, #tpu.memory_space<vmem>>, vector<1x128xf32>
    %56 = vector.broadcast %55 : vector<1x128xf32> to vector<64x128xf32>
    %57 = arith.addf %54, %56 : vector<64x128xf32>
    %cst_65 = arith.constant 0.000000e+00 : f32
    %58 = vector.broadcast %cst_65 : f32 to vector<64x128xf32>
    %59 = arith.cmpf oge, %57, %58 : vector<64x128xf32>
    %cst_66 = arith.constant 2.000000e-01 : f32
    %60 = vector.broadcast %cst_66 : f32 to vector<64x128xf32>
    %61 = arith.mulf %60, %57 : vector<64x128xf32>
    %62 = arith.select %59, %57, %61 : vector<64x128xi1>, vector<64x128xf32>
    %63 = vector.shape_cast %62 : vector<64x128xf32> to vector<4x16x128xf32>
    %c0_67 = arith.constant 0 : index
    %c0_68 = arith.constant 0 : index
    %64 = vector.load %arg4[%c0_67, %c0_68] : memref<16x128xf32, #tpu.memory_space<vmem>>, vector<16x128xf32>
    %c0_69 = arith.constant 0 : index
    %c0_70 = arith.constant 0 : index
    %65 = vector.load %arg5[%c0_69, %c0_70] : memref<1x1xf32, #tpu.memory_space<vmem>>, vector<1x1xf32>
    %66 = vector.shape_cast %64 : vector<16x128xf32> to vector<1x16x128xf32>
    %67 = vector.broadcast %66 : vector<1x16x128xf32> to vector<4x16x128xf32>
    %68 = arith.mulf %63, %67 : vector<4x16x128xf32>
    %cst_71 = arith.constant dense<0.000000e+00> : vector<4x16xf32>
    %69 = vector.multi_reduction <add>, %68, %cst_71 [2] : vector<4x16x128xf32> to vector<4x16xf32>
    %70 = vector.shape_cast %69 : vector<4x16xf32> to vector<4x16x1xf32>
    %cst_72 = arith.constant dense<0.000000e+00> : vector<4x1xf32>
    %71 = vector.multi_reduction <add>, %70, %cst_72 [1] : vector<4x16x1xf32> to vector<4x1xf32>
    %72 = vector.broadcast %65 : vector<1x1xf32> to vector<4x1xf32>
    %73 = arith.addf %71, %72 : vector<4x1xf32>
    %74 = arith.negf %73 : vector<4x1xf32>
    %75 = math.exp %74 : vector<4x1xf32>
    %cst_73 = arith.constant 1.000000e+00 : f32
    %76 = vector.broadcast %cst_73 : f32 to vector<4x1xf32>
    %77 = arith.addf %76, %75 : vector<4x1xf32>
    %78 = arith.divf %76, %77 : vector<4x1xf32>
    %79 = tpu.iota {dimensions = array<i32: 0>} : vector<4x4xi32>
    %80 = tpu.iota {dimensions = array<i32: 1>} : vector<4x4xi32>
    %81 = arith.cmpi eq, %79, %80 : vector<4x4xi32>
    %cst_74 = arith.constant 0.000000e+00 : f32
    %82 = vector.shape_cast %78 : vector<4x1xf32> to vector<4x1xf32>
    %83 = vector.broadcast %82 : vector<4x1xf32> to vector<4x4xf32>
    %84 = vector.broadcast %cst_74 : f32 to vector<4x4xf32>
    %85 = arith.select %81, %83, %84 : vector<4x4xi1>, vector<4x4xf32>
    %cst_75 = arith.constant dense<0.000000e+00> : vector<4xf32>
    %86 = vector.multi_reduction <add>, %85, %cst_75 [0] : vector<4x4xf32> to vector<4xf32>
    %87 = vector.shape_cast %86 : vector<4xf32> to vector<1x4xf32>
    %c0_76 = arith.constant 0 : index
    %c0_77 = arith.constant 0 : index
    %88 = vector.load %arg6[%c0_76, %c0_77] : memref<1x4xf32, #tpu.memory_space<vmem>>, vector<1x4xf32>
    tpu.vector_store %arg6[%c0_76, %c0_77], %87 {strides = array<i32>} : memref<1x4xf32, #tpu.memory_space<vmem>>, vector<1x4xf32>,
    return
  }
  func.func @transform_0(%arg0: i32) -> (i32, i32, i32, i32) {
    %c0_i32 = arith.constant 0 : i32
    %c0_i32_0 = arith.constant 0 : i32
    %c0_i32_1 = arith.constant 0 : i32
    %c0_i32_2 = arith.constant 0 : i32
    return %arg0, %c0_i32, %c0_i32_0, %c0_i32_1 : i32, i32, i32, i32
  }
  func.func @transform_1(%arg0: i32) -> (i32, i32, i32) {
    %c0_i32 = arith.constant 0 : i32
    %c0_i32_0 = arith.constant 0 : i32
    %c0_i32_1 = arith.constant 0 : i32
    %c0_i32_2 = arith.constant 0 : i32
    return %c0_i32, %c0_i32_0, %c0_i32_1 : i32, i32, i32
  }
  func.func @transform_2(%arg0: i32) -> (i32, i32) {
    %c0_i32 = arith.constant 0 : i32
    %c0_i32_0 = arith.constant 0 : i32
    %c0_i32_1 = arith.constant 0 : i32
    return %c0_i32, %c0_i32_0 : i32, i32
  }
  func.func @transform_3(%arg0: i32) -> (i32, i32) {
    %c0_i32 = arith.constant 0 : i32
    %c0_i32_0 = arith.constant 0 : i32
    %c0_i32_1 = arith.constant 0 : i32
    return %c0_i32, %c0_i32_0 : i32, i32
  }
  func.func @transform_4(%arg0: i32) -> (i32, i32) {
    %c0_i32 = arith.constant 0 : i32
    %c0_i32_0 = arith.constant 0 : i32
    %c0_i32_1 = arith.constant 0 : i32
    return %c0_i32, %c0_i32_0 : i32, i32
  }
  func.func @transform_5(%arg0: i32) -> (i32, i32) {
    %c0_i32 = arith.constant 0 : i32
    %c0_i32_0 = arith.constant 0 : i32
    return %c0_i32, %arg0 : i32, i32
  }
}

</mosaic_0001>

<bundles_post_ra>
// kernel: tpu_custom_call.1
= control target key start
LH: loop header
LB: loop body
LE: loop exit
PB: predicated region body
PF: predicated region fallthrough
CT: control target
= control target key end

     0   :  { %s5159_s0 = inlined_call_operand.vmem [shape: f32[4,6,6,160], index: 0, kind: input, shape index: {}]   ;;  %s5160_s1 = inlined_call_operand.hbm [shape: f32[9,160,128], index: 1, kind: input, shape index: {}]   ;;  %s5161_s2 = inlined_call_operand.vmem [shape: f32[1,128], index: 2, kind: input, shape index: {}]   ;;  %s5162_s3 = inlined_call_operand.vmem [shape: f32[16,128], index: 3, kind: input, shape index: {}]   ;;  %s5163_s4 = inlined_call_operand.<no memory space> [shape: f32[1,1], index: 4, kind: input, shape index: {}]   ;;  %s5164_s5 = inlined_call_operand.hbm [shape: f32[1,4], index: 5, kind: output, shape index: {}]  }
   0x1   :  { %v10_v0 = vstv %s5163_s4 }
   0x2   :  { %11 = vst [vmem:[#allocation2] sm:$0x1] %v10_v0 }
   0x3   :  { %12 = vsyncpa [#allocation4], 0 }
   0x4   :  { %13 = vsyncpa [#allocation5], 0  ;;  %s3838_s20 = smov [#allocation3]  }
   0x5   :  { %s21_s21 = sshll.u32 %s3838_s20, 4  ;;  %s22_s21 = int_to_ptr.vmem [resolvable:$true] %s21_s21 }
   0x6   :  { %s3802_s22 = scalar_lea.vmem %s22_s21, 23040  ;;  %p3807_p1 = scmp.lt.s32.totalorder %s22_s21, %s22_s21 }
   0x7   :  { %p3803_p0 = scmp.ne.s32.totalorder %s22_s21, %s3802_s22  ;;  %p3808_p2 = scmp.lt.s32.totalorder %s3802_s22, %s3802_s22 }
   0x9   :  { %p3809_p3 = por %p3808_p2, %p3807_p1 }
   0xb   :  { %p3810_p4 = pnand %p3809_p3, %p3803_p0 }
   0xd   :  { %3813 = shalt.err (!%p3810_p4)
}
   0xe   :  { %s3839_s23 = smov 128   ;;  %s3840_s24 = smov 8  }
   0xf   :  { %27 = dma.hbm_to_vmem [thread:$0]  %s5160_s1, 23040, %s22_s21, [#allocation4], %s3839_s23, %s3839_s23, %s3840_s24  }
  0x10   :  { %3834 = dma.done.wait [#allocation4], 23040  }
  0x11   :  { %3835 = vsyncadd [#allocation4], 4294944256  ;;  %v3841_v1 = vmov 0.0   ;;  %v316_v2 = vld [vmem:[#allocation3 + $0x118] sm:$0xff]  ;;  %v315_v4 = vld [vmem:[#allocation3 + $0x110] sm:$0xff]  ;;  %vm233_vm0 = vcmask 1042432  }
  0x12   :  { %362 = vmatprep.subr.mxu0 %v3841_v1  ;;  %507 = vmatprep.subr.mxu1 %v3841_v1  ;;  %v132_v3 = vld [vmem:[#allocation3 + $0x78] sm:$0xff]  ;;  %v131_v5 = vld [vmem:[#allocation3 + $0x70] sm:$0xff]  ;;  %v314_v6 = vld [vmem:[#allocation3 + $0x108] sm:$0xff]  ;;  %vm234_vm1 = vcmask 1046532   ;;  %vm345_vm3 = vcmask 261120   ;;  %vm708_vm4 = vcmask 1041408  }
  0x13   :  { %363 = vmatpush1.msra.mxu0 %v316_v2  ;;  %508 = vmatpush1.msra.mxu1 %v132_v3  ;;  %v130_v7 = vld [vmem:[#allocation3 + $0x68] sm:$0xff]  ;;  %v313_v8 = vld [vmem:[#allocation3 + $0x100] sm:$0xff]  ;;  %v312_v10 = vld [vmem:[#allocation3 + $0xf8] sm:$0xff]  ;;  %vm709_vm5 = vcmask 1045508   ;;  %vm2945_vm15 = vcmask 1041409  }
  0x14   :  { %364 = vmatprep.subr.mxu0 %v3841_v1  ;;  %509 = vmatprep.subr.mxu1 %v3841_v1  ;;  %v129_v9 = vld [vmem:[#allocation3 + $0x60] sm:$0xff]  ;;  %v128_v11 = vld [vmem:[#allocation3 + $0x58] sm:$0xff]  ;;  %v311_v12 = vld [vmem:[#allocation3 + $0xf0] sm:$0xff] }
  0x15   :  { %365 = vmatpush1.msra.mxu0 %v315_v4  ;;  %510 = vmatpush1.msra.mxu1 %v131_v5  ;;  %v127_v13 = vld [vmem:[#allocation3 + $0x50] sm:$0xff]  ;;  %v310_v14 = vld [vmem:[#allocation3 + $0xe8] sm:$0xff]  ;;  %v309_v16 = vld [vmem:[#allocation3 + $0xe0] sm:$0xff] }
  0x16   :  { %366 = vmatprep.subr.mxu0 %v3841_v1  ;;  %511 = vmatprep.subr.mxu1 %v3841_v1  ;;  %v126_v15 = vld [vmem:[#allocation3 + $0x48] sm:$0xff]  ;;  %v125_v17 = vld [vmem:[#allocation3 + $0x40] sm:$0xff]  ;;  %v308_v18 = vld [vmem:[#allocation3 + $0xd8] sm:$0xff] }
  0x17   :  { %367 = vmatpush1.msra.mxu0 %v314_v6  ;;  %512 = vmatpush1.msra.mxu1 %v130_v7  ;;  %v124_v19 = vld [vmem:[#allocation3 + $0x38] sm:$0xff]  ;;  %v307_v20 = vld [vmem:[#allocation3 + $0xd0] sm:$0xff]  ;;  %v306_v22 = vld [vmem:[#allocation3 + $0xc8] sm:$0xff] }
  0x18   :  { %368 = vmatprep.subr.mxu0 %v3841_v1  ;;  %513 = vmatprep.subr.mxu1 %v3841_v1  ;;  %v123_v21 = vld [vmem:[#allocation3 + $0x30] sm:$0xff]  ;;  %v122_v23 = vld [vmem:[#allocation3 + $0x28] sm:$0xff]  ;;  %v305_v24 = vld [vmem:[#allocation3 + $0xc0] sm:$0xff] }
  0x19   :  { %369 = vmatpush1.msra.mxu0 %v313_v8  ;;  %514 = vmatpush1.msra.mxu1 %v129_v9  ;;  %v121_v25 = vld [vmem:[#allocation3 + $0x20] sm:$0xff]  ;;  %v304_v26 = vld [vmem:[#allocation3 + $0xb8] sm:$0xff]  ;;  %v303_v30 = vld [vmem:[#allocation3 + $0xb0] sm:$0xff] }
  0x1a   :  { %370 = vmatprep.subr.mxu0 %v3841_v1  ;;  %515 = vmatprep.subr.mxu1 %v3841_v1  ;;  %v120_v27 = vld [vmem:[#allocation3 + $0x18] sm:$0xff]  ;;  %v3442_v28 = vld [vmem:[%s5159_s0] ss:$8 sps:$4 sm:$0xee]   ;;  %v119_v31 = vld [vmem:[#allocation3 + $0x10] sm:$0xff] }
  0x1b   :  { %371 = vmatpush1.msra.mxu0 %v312_v10  ;;  %516 = vmatpush1.msra.mxu1 %v128_v11  ;;  %v3444_v29 = vld [vmem:[%s5159_s0 + $0x4] ss:$8 sps:$4 sm:$0x11]   ;;  %v3445_v32 = vld [vmem:[%s5159_s0 + $0x10] ss:$8 sps:$4 sm:$0xee]   ;;  %vm3922_vm2 = vmor %vm233_vm0, %vm234_vm1 }
  0x1c   :  { %372 = vmatprep.subr.mxu0 %v3841_v1  ;;  %517 = vmatprep.subr.mxu1 %v3841_v1  ;;  %v3447_v33 = vld [vmem:[%s5159_s0 + $0x14] ss:$8 sps:$4 sm:$0x11]   ;;  %v302_v34 = vld [vmem:[#allocation3 + $0xa8] sm:$0xff]  ;;  %v301_v36 = vld [vmem:[#allocation3 + $0xa0] sm:$0xff]  ;;  %v2980_v38 = vrot.slane %v3442_v28, 9 }
  0x1d   :  { %373 = vmatpush1.msra.mxu0 %v311_v12  ;;  %518 = vmatpush1.msra.mxu1 %v127_v13  ;;  %v118_v35 = vld [vmem:[#allocation3 + $0x8] sm:$0xff]  ;;  %v117_v37 = vld [vmem:[#allocation3] sm:$0xff]  ;;  %v238_v39 = vrot.slane %v3444_v29, 5  ;;  %v2981_v41 = vrot.slane %v3445_v32, 9  ;;  %v242_v42 = vrot.slane %v3447_v33, 5  ;;  %v320_v43 = vld [vmem:[#allocation3 + $0x138] sm:$0xff] }
  0x1e   :  { %374 = vmatprep.subr.mxu0 %v3841_v1  ;;  %519 = vmatprep.subr.mxu1 %v3841_v1  ;;  %v136_v44 = vld [vmem:[#allocation3 + $0x98] sm:$0xff]  ;;  %v319_v45 = vld [vmem:[#allocation3 + $0x130] sm:$0xff]  ;;  %v3450_v49 = vld [vmem:[%s5159_s0 + $0x20] ss:$8 sps:$4 sm:$0xee]   ;;  %vm2948_vm0 = vcmask 1042434  }
  0x1f   :  { %375 = vmatpush1.msra.mxu0 %v310_v14  ;;  %520 = vmatpush1.msra.mxu1 %v126_v15  ;;  %v135_v46 = vld [vmem:[#allocation3 + $0x90] sm:$0xff]  ;;  %v239_v47 = vsel %vm3922_vm2, %v2980_v38, %v238_v39  ;;  %v243_v48 = vsel %vm3922_vm2, %v2981_v41, %v242_v42  ;;  %v318_v50 = vld [vmem:[#allocation3 + $0x128] sm:$0xff]  ;;  %v317_v54 = vld [vmem:[#allocation3 + $0x120] sm:$0xff]  ;;  %v2982_v63 = vrot.slane %v3450_v49, 9  ;;  %vm2951_vm1 = vcmask 1043459  }
  0x20   :  { %376 = vmatprep.subr.mxu0 %v3841_v1  ;;  %521 = vmatprep.subr.mxu1 %v3841_v1  ;;  %v3452_v51 = vld [vmem:[%s5159_s0 + $0x24] ss:$8 sps:$4 sm:$0x11]   ;;  %v3453_v53 = vld [vmem:[%s5159_s0 + $0x30] ss:$8 sps:$4 sm:$0xee]   ;;  %v322_v55 = vcombine.high %v239_v47, %v243_v48  ;;  %v321_v57 = vcombine.low %v239_v47, %v243_v48  ;;  %vm4165_vm6 = vmor %vm708_vm4, %vm709_vm5 }
  0x21   :  { %377 = vmatpush1.msra.mxu0 %v309_v16  ;;  %522 = vmatpush1.msra.mxu1 %v125_v17  ;;  %v134_v52 = vld [vmem:[#allocation3 + $0x88] sm:$0xff]  ;;  %v3455_v56 = vld [vmem:[%s5159_s0 + $0x34] ss:$8 sps:$4 sm:$0x11]   ;;  %v133_v58 = vld [vmem:[#allocation3 + $0x80] sm:$0xff]  ;;  %v246_v0 = vrot.slane %v3452_v51, 5 }
  0x22   :  { %378 = vmatprep.subr.mxu0 %v3841_v1  ;;  %523 = vmatprep.subr.mxu1 %v3841_v1  ;;  %v3448_v59 = vld [vmem:[%s5159_s0 + $0x8] ss:$16 sps:$4 sm:$0xff]   ;;  %v3449_v60 = vld [vmem:[%s5159_s0] ss:$16 sps:$4 sm:$0xff]   ;;  %v2983_v5 = vrot.slane %v3453_v53, 9  ;;  %v250_v7 = vrot.slane %v3455_v56, 5 }
  0x23   :  { %379 = vmatpush1.msra.mxu0 %v308_v18  ;;  %524 = vmatpush1.msra.mxu1 %v124_v19  ;;  %v791_v61 = vld [vmem:[#allocation3 + $0x1b8] sm:$0xff]  ;;  %v3458_v2 = vld [vmem:[%s5159_s0 + $0x60] ss:$8 sps:$4 sm:$0xee]   ;;  %v790_v4 = vld [vmem:[#allocation3 + $0x1b0] sm:$0xff]  ;;  %v247_v12 = vsel %vm3922_vm2, %v2982_v63, %v246_v0  ;;  %vm2963_vm4 = vcmask 24576  }
  0x24   :  { %380 = vmatprep.subr.mxu0 %v3841_v1  ;;  %525 = vmatprep.subr.mxu1 %v3841_v1  ;;  %v1046_v62 = vld [vmem:[#allocation3 + $0x258] sm:$0xff]  ;;  %v3460_v3 = vld [vmem:[%s5159_s0 + $0x64] ss:$8 sps:$4 sm:$0x11]   ;;  %v1045_v9 = vld [vmem:[#allocation3 + $0x250] sm:$0xff]  ;;  %v251_v15 = vsel %vm3922_vm2, %v2983_v5, %v250_v7  ;;  %v2984_v16 = vrot.slane %v3458_v2, 9 }
  0x25   :  { %381 = vmatpush1.msra.mxu0 %v307_v20  ;;  %526 = vmatpush1.msra.mxu1 %v123_v21  ;;  %v3461_v6 = vld [vmem:[%s5159_s0 + $0x70] ss:$8 sps:$4 sm:$0xee]   ;;  %v3463_v8 = vld [vmem:[%s5159_s0 + $0x74] ss:$8 sps:$4 sm:$0x11]  }
  0x26   :  { %382 = vmatprep.subr.mxu0 %v3841_v1  ;;  %527 = vmatprep.subr.mxu1 %v3841_v1  ;;  %v789_v10 = vld [vmem:[#allocation3 + $0x1a8] sm:$0xff]  ;;  %v788_v13 = vld [vmem:[#allocation3 + $0x1a0] sm:$0xff]  ;;  %v254_v17 = vrot.slane %v3460_v3, 5  ;;  %v2985_v18 = vrot.slane %v3461_v6, 9  ;;  %v787_v19 = vld [vmem:[#allocation3 + $0x198] sm:$0xff] }
  0x27   :  { %383 = vmatpush1.msra.mxu0 %v306_v22  ;;  %528 = vmatpush1.msra.mxu1 %v122_v23  ;;  %v1044_v11 = vld [vmem:[#allocation3 + $0x248] sm:$0xff]  ;;  %v1043_v14 = vld [vmem:[#allocation3 + $0x240] sm:$0xff]  ;;  %v258_v22 = vrot.slane %v3463_v8, 5  ;;  %v3469_v23 = vld [vmem:[%s5159_s0 + $0x90] ss:$8 sps:$4 sm:$0xee]  }
  0x28   :  { %384 = vmatprep.subr.mxu0 %v3841_v1  ;;  %529 = vmatprep.subr.mxu1 %v3841_v1  ;;  %v3466_v20 = vld [vmem:[%s5159_s0 + $0x80] ss:$8 sps:$4 sm:$0xee]   ;;  %v3468_v21 = vld [vmem:[%s5159_s0 + $0x84] ss:$8 sps:$4 sm:$0x11]  }
  0x29   :  { %385 = vmatpush1.msra.mxu0 %v305_v24  ;;  %530 = vmatpush1.msra.mxu1 %v121_v25  ;;  %v1042_v24 = vld [vmem:[#allocation3 + $0x238] sm:$0xff]  ;;  %v324_v25 = vcombine.high %v247_v12, %v251_v15  ;;  %v786_v28 = vld [vmem:[#allocation3 + $0x190] sm:$0xff]  ;;  %v259_v32 = vsel %vm3922_vm2, %v2985_v18, %v258_v22  ;;  %v3474_v39 = vld [vmem:[%s5159_s0 + $0xc0] ss:$8 sps:$4 sm:$0xee]  }
  0x2a   :  { %386 = vmatprep.subr.mxu0 %v3841_v1  ;;  %531 = vmatprep.subr.mxu1 %v3841_v1  ;;  %v1041_v29 = vld [vmem:[#allocation3 + $0x230] sm:$0xff]  ;;  %v3476_v41 = vld [vmem:[%s5159_s0 + $0xc4] ss:$8 sps:$4 sm:$0x11]   ;;  %v783_v53 = vld [vmem:[#allocation3 + $0x178] sm:$0xff] }
  0x2b   :  { %387 = vmatpush1.msra.mxu0 %v304_v26  ;;  %532 = vmatpush1.msra.mxu1 %v120_v27  ;;  %v3471_v26 = vld [vmem:[%s5159_s0 + $0x94] ss:$8 sps:$4 sm:$0x11]   ;;  %v323_v27 = vcombine.low %v247_v12, %v251_v15  ;;  %v3457_v33 = vld [vmem:[%s5159_s0 + $0x20] ss:$16 sps:$4 sm:$0xff]   ;;  %v270_v56 = vrot.slane %v3476_v41, 5 }
  0x2c   :  { %388 = vmatprep.subr.mxu0 %v3841_v1  ;;  %533 = vmatprep.subr.mxu1 %v3841_v1  ;;  %v266_v38 = vrot.slane %v3471_v26, 5  ;;  %v1040_v42 = vld [vmem:[#allocation3 + $0x228] sm:$0xff]  ;;  %v1039_v47 = vld [vmem:[#allocation3 + $0x220] sm:$0xff]  ;;  %v3479_v48 = vld [vmem:[%s5159_s0 + $0xd4] ss:$8 sps:$4 sm:$0x11]  }
  0x2d   :  { %389 = vmatpush1.msra.mxu0 %v303_v30  ;;  %534 = vmatpush1.msra.mxu1 %v119_v31  ;;  %v3456_v30 = vld [vmem:[%s5159_s0 + $0x28] ss:$16 sps:$4 sm:$0xff]   ;;  %v255_v31 = vsel %vm3922_vm2, %v2984_v16, %v254_v17  ;;  %v3487_v2 = vld [vmem:[%s5159_s0 + $0xf4] ss:$8 sps:$4 sm:$0x11]  }
  0x2e   :  { %390 = vmatprep.subr.mxu0 %v3841_v1  ;;  %535 = vmatprep.subr.mxu1 %v3841_v1  ;;  %v3464_v49 = vld [vmem:[%s5159_s0 + $0x68] ss:$16 sps:$4 sm:$0xff]   ;;  %v3473_v5 = vld [vmem:[%s5159_s0 + $0x80] ss:$16 sps:$4 sm:$0xff]  }
  0x2f   :  { %391 = vmatpush1.msra.mxu0 %v302_v34  ;;  %536 = vmatpush1.msra.mxu1 %v118_v35  ;;  %v785_v34 = vld [vmem:[#allocation3 + $0x188] sm:$0xff]  ;;  %v2986_v35 = vrot.slane %v3466_v20, 9  ;;  %v782_v0 = vld [vmem:[#allocation3 + $0x170] sm:$0xff]  ;;  %v1035_v20 = vld [vmem:[#allocation3 + $0x200] sm:$0xff] }
  0x30   :  { %392 = vmatprep.subr.mxu0 %v3841_v1  ;;  %537 = vmatprep.subr.mxu1 %v3841_v1  ;;  %v1037_v3 = vld [vmem:[#allocation3 + $0x210] sm:$0xff]  ;;  %v3490_v8 = vld [vmem:[%s5159_s0 + $0x120] ss:$8 sps:$4 sm:$0xee]  }
  0x31   :  { %393 = vmatpush1.msra.mxu0 %v301_v36  ;;  %538 = vmatpush1.msra.mxu1 %v117_v37  ;;  %v262_v36 = vrot.slane %v3468_v21, 5  ;;  %v2987_v37 = vrot.slane %v3469_v23, 9  ;;  %v3492_v16 = vld [vmem:[%s5159_s0 + $0x124] ss:$8 sps:$4 sm:$0x11]   ;;  %v2992_v26 = vrot.slane %v3490_v8, 9 }
  0x32   :  { %418 = vmatprep.subr.mxu0 %v3841_v1  ;;  %563 = vmatprep.subr.mxu1 %v3841_v1  ;;  %v3493_v17 = vld [vmem:[%s5159_s0 + $0x130] ss:$8 sps:$4 sm:$0xee]   ;;  %v3495_v21 = vld [vmem:[%s5159_s0 + $0x134] ss:$8 sps:$4 sm:$0x11]  }
  0x33   :  { %419 = vmatpush2.msra.mxu0 %v320_v43  ;;  %564 = vmatpush2.msra.mxu1 %v136_v44  ;;  %v326_v43 = vcombine.high %v255_v31, %v259_v32  ;;  %v3477_v44 = vld [vmem:[%s5159_s0 + $0xd0] ss:$8 sps:$4 sm:$0xee]   ;;  %v263_v51 = vsel %vm3922_vm2, %v2986_v35, %v262_v36  ;;  %v3735_v40 = vld [vmem:[%s5159_s0 + $0x34] ss:$8 sps:$4 sm:$0x33]  }
  0x34   :  { %420 = vmatprep.subr.mxu0 %v3841_v1  ;;  %565 = vmatprep.subr.mxu1 %v3841_v1  ;;  %v3480_v22 = vld [vmem:[%s5159_s0 + $0xc8] ss:$16 sps:$4 sm:$0xff]   ;;  %v3481_v23 = vld [vmem:[%s5159_s0 + $0xc0] ss:$16 sps:$4 sm:$0xff]  }
  0x35   :  { %421 = vmatpush2.msra.mxu0 %v319_v45  ;;  %566 = vmatpush2.msra.mxu1 %v135_v46  ;;  %v325_v45 = vcombine.low %v255_v31, %v259_v32  ;;  %v784_v46 = vld [vmem:[#allocation3 + $0x180] sm:$0xff]  ;;  %v2993_v31 = vrot.slane %v3493_v17, 9  ;;  %v290_v32 = vrot.slane %v3495_v21, 5  ;;  %v3501_v36 = vld [vmem:[%s5159_s0 + $0x150] ss:$8 sps:$4 sm:$0xee]  }
  0x36   :  { %422 = vmatprep.subr.mxu0 %v3841_v1  ;;  %567 = vmatprep.subr.mxu1 %v3841_v1  ;;  %v1033_v41 = vld [vmem:[#allocation3 + $0x1f0] sm:$0xff] }
  0x37   :  { %423 = vmatpush2.msra.mxu0 %v318_v50  ;;  %568 = vmatpush2.msra.mxu1 %v134_v52  ;;  %v3465_v50 = vld [vmem:[%s5159_s0 + $0x60] ss:$16 sps:$4 sm:$0xff]   ;;  %v267_v52 = vsel %vm3922_vm2, %v2987_v37, %v266_v38  ;;  %v3503_v37 = vld [vmem:[%s5159_s0 + $0x154] ss:$8 sps:$4 sm:$0x11]  }
  0x38   :  { %424 = vmatprep.subr.mxu0 %v3841_v1  ;;  %569 = vmatprep.subr.mxu1 %v3841_v1  ;;  %v327_v63 = vcombine.low %v263_v51, %v267_v52  ;;  %v778_v38 = vld [vmem:[#allocation3 + $0x150] sm:$0xff] }
  0x39   :  { %425 = vmatpush2.msra.mxu0 %v317_v54  ;;  %2996 = vmatprep.mubr.msk.f32.mxu0 %vm345_vm3, %v322_v55  ;;  %v1038_v54 = vld [vmem:[#allocation3 + $0x218] sm:$0xff]  ;;  %v2988_v55 = vrot.slane %v3474_v39, 9 }
  0x3a   :  { %570 = vmatpush2.msra.mxu1 %v133_v58  ;;  %427 = vmatmul.mubr.f32.vlgmr.msra.gmra.mxu0 %v321_v57  ;;  %v2989_v57 = vrot.slane %v3477_v44, 9  ;;  %v274_v58 = vrot.slane %v3479_v48, 5  ;;  %v3488_v39 = vld [vmem:[%s5159_s0 + $0xe8] ss:$16 sps:$4 sm:$0xff]   ;;  %v291_v44 = vsel %vm3922_vm2, %v2993_v31, %v290_v32 }
  0x3b   :  { %3020 = vmatprep.mubr.msk.f32.mxu1 %vm345_vm3, %v3448_v59  ;;  %836 = vmatprep.subr.mxu0 %v3841_v1  ;;  %v3482_v59 = vld [vmem:[%s5159_s0 + $0xe0] ss:$8 sps:$4 sm:$0xee]   ;;  %v271_v6 = vsel %vm3922_vm2, %v2988_v55, %v270_v56 }
  0x3c   :  { %1091 = vmatprep.subr.mxu1 %v3841_v1  ;;  %572 = vmatmul.mubr.f32.vlgmr.msra.gmra.mxu1 %v3449_v60  ;;  %v328_v60 = vcombine.high %v263_v51, %v267_v52  ;;  %v275_v7 = vsel %vm3922_vm2, %v2989_v57, %v274_v58  ;;  %v4125_v48 = vld [vmem:[%s5159_s0] ss:$8 sps:$4 sm:$0xcc]   ;;  %v3508_v51 = vld [vmem:[%s5159_s0 + $0x4] ss:$8 sps:$4 sm:$0x33]  }
  0x3d   :  { %837 = vmatpush1.msra.mxu0 %v791_v61  ;;  %1092 = vmatpush1.msra.mxu1 %v1046_v62  ;;  %v3484_v61 = vld [vmem:[%s5159_s0 + $0xe4] ss:$8 sps:$4 sm:$0x11]   ;;  %v3485_v62 = vld [vmem:[%s5159_s0 + $0xf0] ss:$8 sps:$4 sm:$0xee]   ;;  %v330_v15 = vcombine.high %v271_v6, %v275_v7  ;;  %v329_v18 = vcombine.low %v271_v6, %v275_v7 }
  0x3e   :  { %838 = vmatprep.subr.mxu0 %v3841_v1  ;;  %1093 = vmatprep.subr.mxu1 %v3841_v1  ;;  %v278_v12 = vrot.slane %v3484_v61, 5  ;;  %v1032_v52 = vld [vmem:[#allocation3 + $0x1e8] sm:$0xff]  ;;  %v776_v55 = vld [vmem:[#allocation3 + $0x140] sm:$0xff]  ;;  %v3509_v57 = vld [vmem:[%s5159_s0 + $0x10] ss:$8 sps:$4 sm:$0xcc]  }
  0x3f   :  { %839 = vmatpush1.msra.mxu0 %v790_v4  ;;  %1094 = vmatpush1.msra.mxu1 %v1045_v9  ;;  %v3472_v4 = vld [vmem:[%s5159_s0 + $0x88] ss:$16 sps:$4 sm:$0xff]   ;;  %v3511_v58 = vld [vmem:[%s5159_s0 + $0x14] ss:$8 sps:$4 sm:$0x33]  }
  0x40   :  { %840 = vmatprep.subr.mxu0 %v3841_v1  ;;  %1095 = vmatprep.subr.mxu1 %v3841_v1  ;;  %v781_v9 = vld [vmem:[#allocation3 + $0x168] sm:$0xff]  ;;  %v3517_v6 = vld [vmem:[%s5159_s0 + $0x30] ss:$8 sps:$4 sm:$0xcc]   ;;  %v1047_v32 = vld [vmem:[#allocation3 + $0x260] sm:$0xff] }
  0x41   :  { %841 = vmatpush1.msra.mxu0 %v789_v10  ;;  %1096 = vmatpush1.msra.mxu1 %v1044_v11  ;;  %v1036_v10 = vld [vmem:[#allocation3 + $0x208] sm:$0xff]  ;;  %v2990_v11 = vrot.slane %v3482_v59, 9  ;;  %v1031_v59 = vld [vmem:[#allocation3 + $0x1e0] sm:$0xff] }
  0x42   :  { %842 = vmatprep.subr.mxu0 %v3841_v1  ;;  %1097 = vmatprep.subr.mxu1 %v3841_v1  ;;  %v3496_v56 = vld [vmem:[%s5159_s0 + $0x128] ss:$16 sps:$4 sm:$0xff]  }
  0x43   :  { %843 = vmatpush1.msra.mxu0 %v788_v13  ;;  %1098 = vmatpush1.msra.mxu1 %v1043_v14  ;;  %v2991_v13 = vrot.slane %v3485_v62, 9  ;;  %v282_v14 = vrot.slane %v3487_v2, 5  ;;  %v1050_v2 = vld [vmem:[#allocation3 + $0x278] sm:$0xff] }
  0x44   :  { %844 = vmatprep.subr.mxu0 %v3841_v1  ;;  %1099 = vmatprep.subr.mxu1 %v3841_v1 }
  0x45   :  { %845 = vmatpush1.msra.mxu0 %v787_v19  ;;  %1100 = vmatpush1.msra.mxu1 %v1042_v24  ;;  %v780_v19 = vld [vmem:[#allocation3 + $0x160] sm:$0xff]  ;;  %v279_v24 = vsel %vm3922_vm2, %v2990_v11, %v278_v12  ;;  %v3519_v11 = vld [vmem:[%s5159_s0 + $0x34] ss:$8 sps:$4 sm:$0x33]  }
  0x46   :  { %2997 = vmatprep.mubr.msk.f32.mxu0 %vm345_vm3, %v324_v25  ;;  %846 = vmatprep.subr.mxu0 %v3841_v1  ;;  %v283_v25 = vsel %vm3922_vm2, %v2991_v13, %v282_v14  ;;  %v794_v13 = vld [vmem:[#allocation3 + $0x1d0] sm:$0xff] }
  0x47   :  { %1101 = vmatprep.subr.mxu1 %v3841_v1  ;;  %432 = vmatmul.mubr.f32.gmra.mxu0 %v323_v27  ;;  %v3498_v27 = vld [vmem:[%s5159_s0 + $0x140] ss:$8 sps:$4 sm:$0xee]   ;;  %v331_v35 = vcombine.low %v279_v24, %v283_v25  ;;  %v1049_v14 = vld [vmem:[#allocation3 + $0x270] sm:$0xff] }
  0x48   :  { %847 = vmatpush1.msra.mxu0 %v786_v28  ;;  %1102 = vmatpush1.msra.mxu1 %v1041_v29  ;;  %v779_v28 = vld [vmem:[#allocation3 + $0x158] sm:$0xff] }
  0x49   :  { %3021 = vmatprep.mubr.msk.f32.mxu1 %vm345_vm3, %v3456_v30  ;;  %848 = vmatprep.subr.mxu0 %v3841_v1  ;;  %v1034_v29 = vld [vmem:[#allocation3 + $0x1f8] sm:$0xff]  ;;  %v286_v30 = vrot.slane %v3492_v16, 5 }
  0x4a   :  { %1103 = vmatprep.subr.mxu1 %v3841_v1  ;;  %577 = vmatmul.mubr.f32.gmra.mxu1 %v3457_v33  ;;  %v3500_v33 = vld [vmem:[%s5159_s0 + $0x144] ss:$8 sps:$4 sm:$0x11]   ;;  %v3505_v16 = vld [vmem:[%s5159_s0 + $0x140] ss:$16 sps:$4 sm:$0xff]  }
  0x4b   :  { %849 = vmatpush1.msra.mxu0 %v785_v34  ;;  %1104 = vmatpush1.msra.mxu1 %v1040_v42  ;;  %v332_v34 = vcombine.high %v279_v24, %v283_v25  ;;  %v3489_v42 = vld [vmem:[%s5159_s0 + $0xe0] ss:$16 sps:$4 sm:$0xff]   ;;  %v3524_v24 = vld [vmem:[%s5159_s0 + $0x64] ss:$8 sps:$4 sm:$0x33]   ;;  %v3031_v25 = vrot.slane %v3517_v6, 10 }
  0x4c   :  { %2998 = vmatprep.mubr.msk.f32.mxu0 %vm345_vm3, %v326_v43  ;;  %850 = vmatprep.subr.mxu0 %v3841_v1  ;;  %v287_v43 = vsel %vm3922_vm2, %v2992_v26, %v286_v30  ;;  %v3525_v26 = vld [vmem:[%s5159_s0 + $0x70] ss:$8 sps:$4 sm:$0xcc]   ;;  %v3543_v6 = vld [vmem:[%s5159_s0 + $0xd4] ss:$8 sps:$4 sm:$0x33]  }
  0x4d   :  { %1105 = vmatprep.subr.mxu1 %v3841_v1  ;;  %437 = vmatmul.mubr.f32.gmra.mxu0 %v325_v45  ;;  %v2994_v45 = vrot.slane %v3498_v27, 9  ;;  %v725_v27 = vrot.slane %v3519_v11, 6 }
  0x4e   :  { %851 = vmatpush1.msra.mxu0 %v784_v46  ;;  %1106 = vmatpush1.msra.mxu1 %v1039_v47  ;;  %v777_v46 = vld [vmem:[#allocation3 + $0x148] sm:$0xff]  ;;  %v294_v47 = vrot.slane %v3500_v33, 5 }
  0x4f   :  { %3022 = vmatprep.mubr.msk.f32.mxu1 %vm345_vm3, %v3464_v49  ;;  %852 = vmatprep.subr.mxu0 %v3841_v1  ;;  %v2995_v49 = vrot.slane %v3501_v36, 9  ;;  %v3512_v33 = vld [vmem:[%s5159_s0 + $0x18] ss:$16 sps:$4 sm:$0xff]  }
  0x50   :  { %1107 = vmatprep.subr.mxu1 %v3841_v1  ;;  %582 = vmatmul.mubr.f32.gmra.mxu1 %v3465_v50  ;;  %v298_v50 = vrot.slane %v3503_v37, 5  ;;  %v295_v61 = vsel %vm3922_vm2, %v2994_v45, %v294_v47  ;;  %v1380_v36 = vld [vmem:[#allocation3 + $0x2f8] sm:$0xff] }
  0x51   :  { %853 = vmatpush1.msra.mxu0 %v783_v53  ;;  %1108 = vmatpush1.msra.mxu1 %v1038_v54  ;;  %v334_v53 = vcombine.high %v287_v43, %v291_v44  ;;  %v333_v54 = vcombine.low %v287_v43, %v291_v44  ;;  %v1714_v37 = vld [vmem:[#allocation3 + $0x398] sm:$0xff]  ;;  %v3530_v43 = vld [vmem:[%s5159_s0 + $0x80] ss:$8 sps:$4 sm:$0xcc]  }
  0x52   :  { %2999 = vmatprep.mubr.msk.f32.mxu0 %vm345_vm3, %v328_v60  ;;  %854 = vmatprep.subr.mxu0 %v3841_v1  ;;  %v3497_v60 = vld [vmem:[%s5159_s0 + $0x120] ss:$16 sps:$4 sm:$0xff]   ;;  %v299_v62 = vsel %vm3922_vm2, %v2995_v49, %v298_v50  ;;  %v3532_v44 = vld [vmem:[%s5159_s0 + $0x84] ss:$8 sps:$4 sm:$0x33]  }
  0x53   :  { %1109 = vmatprep.subr.mxu1 %v3841_v1  ;;  %442 = vmatmul.mubr.f32.gmra.mxu0 %v327_v63  ;;  %v3514_v63 = vld [vmem:[%s5159_s0 + $0x20] ss:$8 sps:$4 sm:$0xcc]   ;;  %v336_v7 = vcombine.high %v295_v61, %v299_v62  ;;  %v335_v12 = vcombine.low %v295_v61, %v299_v62  ;;  %v3535_v49 = vld [vmem:[%s5159_s0 + $0x94] ss:$8 sps:$4 sm:$0x33]  }
  0x54   :  { %855 = vmatpush1.msra.mxu0 %v782_v0  ;;  %1110 = vmatpush1.msra.mxu1 %v1037_v3  ;;  %v795_v0 = vld [vmem:[#allocation3 + $0x1d8] sm:$0xff]  ;;  %v3028_v3 = vrot.slane %v4125_v48, 10  ;;  %v3030_v17 = vrot.slane %v3514_v63, 10  ;;  %v1379_v48 = vld [vmem:[#allocation3 + $0x2f0] sm:$0xff]  ;;  %v741_v61 = vrot.slane %v3535_v49, 6 }
  0x55   :  { %3023 = vmatprep.mubr.msk.f32.mxu1 %vm345_vm3, %v3472_v4  ;;  %856 = vmatprep.subr.mxu0 %v3841_v1  ;;  %v3516_v4 = vld [vmem:[%s5159_s0 + $0x24] ss:$8 sps:$4 sm:$0x33]   ;;  %v1713_v50 = vld [vmem:[#allocation3 + $0x390] sm:$0xff] }
  0x56   :  { %1111 = vmatprep.subr.mxu1 %v3841_v1  ;;  %587 = vmatmul.mubr.f32.gmra.mxu1 %v3473_v5  ;;  %v713_v5 = vrot.slane %v3508_v51, 6  ;;  %v3538_v62 = vld [vmem:[%s5159_s0 + $0xc0] ss:$8 sps:$4 sm:$0xcc]  }
  0x57   :  { %857 = vmatpush1.msra.mxu0 %v781_v9  ;;  %1112 = vmatpush1.msra.mxu1 %v1036_v10  ;;  %v3029_v9 = vrot.slane %v3509_v57, 10  ;;  %v717_v10 = vrot.slane %v3511_v58, 6  ;;  %v3521_v57 = vld [vmem:[%s5159_s0 + $0x30] ss:$16 sps:$4 sm:$0xff]   ;;  %v3034_v58 = vrot.slane %v3530_v43, 10 }
  0x58   :  { %3000 = vmatprep.mubr.msk.f32.mxu0 %vm345_vm3, %v330_v15  ;;  %858 = vmatprep.subr.mxu0 %v3841_v1  ;;  %v3504_v15 = vld [vmem:[%s5159_s0 + $0x148] ss:$16 sps:$4 sm:$0xff]   ;;  %v714_v21 = vsel %vm4165_vm6, %v3028_v3, %v713_v5  ;;  %v3540_v63 = vld [vmem:[%s5159_s0 + $0xc4] ss:$8 sps:$4 sm:$0x33]  }
  0x59   :  { %1113 = vmatprep.subr.mxu1 %v3841_v1  ;;  %447 = vmatmul.mubr.f32.gmra.mxu0 %v329_v18  ;;  %v721_v18 = vrot.slane %v3516_v4, 6  ;;  %v3541_v3 = vld [vmem:[%s5159_s0 + $0xd0] ss:$8 sps:$4 sm:$0xcc]   ;;  %v1711_v4 = vld [vmem:[#allocation3 + $0x380] sm:$0xff] }
  0x5a   :  { %859 = vmatpush1.msra.mxu0 %v780_v19  ;;  %1114 = vmatpush1.msra.mxu1 %v1035_v20  ;;  %v793_v19 = vld [vmem:[#allocation3 + $0x1c8] sm:$0xff]  ;;  %v3557_v43 = vld [vmem:[%s5159_s0 + $0x130] ss:$8 sps:$4 sm:$0xcc]  }
  0x5b   :  { %3024 = vmatprep.mubr.msk.f32.mxu1 %vm345_vm3, %v3480_v22  ;;  %860 = vmatprep.subr.mxu0 %v3841_v1  ;;  %v1048_v20 = vld [vmem:[#allocation3 + $0x268] sm:$0xff]  ;;  %v718_v22 = vsel %vm4165_vm6, %v3029_v9, %v717_v10  ;;  %v1376_v9 = vld [vmem:[#allocation3 + $0x2d8] sm:$0xff] }
  0x5c   :  { %1115 = vmatprep.subr.mxu1 %v3841_v1  ;;  %592 = vmatmul.mubr.f32.gmra.mxu1 %v3481_v23  ;;  %v3522_v23 = vld [vmem:[%s5159_s0 + $0x60] ss:$8 sps:$4 sm:$0xcc]   ;;  %v797_v30 = vcombine.high %v714_v21, %v718_v22  ;;  %v796_v31 = vcombine.low %v714_v21, %v718_v22  ;;  %v3548_v21 = vld [vmem:[%s5159_s0 + $0xe4] ss:$8 sps:$4 sm:$0x33]  }
  0x5d   :  { %861 = vmatpush1.msra.mxu0 %v779_v28  ;;  %1116 = vmatpush1.msra.mxu1 %v1034_v29  ;;  %v3527_v28 = vld [vmem:[%s5159_s0 + $0x74] ss:$8 sps:$4 sm:$0x33]   ;;  %v792_v29 = vld [vmem:[#allocation3 + $0x1c0] sm:$0xff] }
  0x5e   :  { %3001 = vmatprep.mubr.msk.f32.mxu0 %vm345_vm3, %v332_v34  ;;  %862 = vmatprep.subr.mxu0 %v3841_v1  ;;  %v722_v34 = vsel %vm4165_vm6, %v3030_v17, %v721_v18  ;;  %v733_v45 = vrot.slane %v3527_v28, 6  ;;  %v3529_v10 = vld [vmem:[%s5159_s0 + $0x70] ss:$16 sps:$4 sm:$0xff]   ;;  %v3037_v17 = vrot.slane %v3541_v3, 10  ;;  %v749_v18 = vrot.slane %v3543_v6, 6 }
  0x5f   :  { %1117 = vmatprep.subr.mxu1 %v3841_v1  ;;  %452 = vmatmul.mubr.f32.gmra.mxu0 %v331_v35  ;;  %v3513_v35 = vld [vmem:[%s5159_s0 + $0x10] ss:$16 sps:$4 sm:$0xff]  }
  0x60   :  { %863 = vmatpush1.msra.mxu0 %v778_v38  ;;  %1118 = vmatpush1.msra.mxu1 %v1033_v41  ;;  %v726_v38 = vsel %vm4165_vm6, %v3031_v25, %v725_v27  ;;  %v729_v41 = vrot.slane %v3524_v24, 6  ;;  %v3549_v22 = vld [vmem:[%s5159_s0 + $0xf0] ss:$8 sps:$4 sm:$0xcc]   ;;  %v1374_v27 = vld [vmem:[#allocation3 + $0x2c8] sm:$0xff] }
  0x61   :  { %3025 = vmatprep.mubr.msk.f32.mxu1 %vm345_vm3, %v3488_v39  ;;  %864 = vmatprep.subr.mxu0 %v3841_v1  ;;  %v3032_v39 = vrot.slane %v3522_v23, 10  ;;  %v799_v47 = vcombine.high %v722_v34, %v726_v38  ;;  %v798_v51 = vcombine.low %v722_v34, %v726_v38  ;;  %v1709_v23 = vld [vmem:[#allocation3 + $0x370] sm:$0xff]  ;;  %v1708_v28 = vld [vmem:[#allocation3 + $0x368] sm:$0xff]  ;;  %v1373_v34 = vld [vmem:[#allocation3 + $0x2c0] sm:$0xff] }
  0x62   :  { %1119 = vmatprep.subr.mxu1 %v3841_v1  ;;  %597 = vmatmul.mubr.f32.gmra.mxu1 %v3489_v42  ;;  %v3033_v42 = vrot.slane %v3525_v26, 10  ;;  %v3551_v25 = vld [vmem:[%s5159_s0 + $0xf4] ss:$8 sps:$4 sm:$0x33]   ;;  %v3536_v26 = vld [vmem:[%s5159_s0 + $0x98] ss:$16 sps:$4 sm:$0xff]  }
  0x63   :  { %865 = vmatpush1.msra.mxu0 %v777_v46  ;;  %1120 = vmatpush1.msra.mxu1 %v1032_v52  ;;  %v3533_v46 = vld [vmem:[%s5159_s0 + $0x90] ss:$8 sps:$4 sm:$0xcc]   ;;  %v1707_v38 = vld [vmem:[#allocation3 + $0x360] sm:$0xff] }
  0x64   :  { %3002 = vmatprep.mubr.msk.f32.mxu0 %vm345_vm3, %v334_v53  ;;  %866 = vmatprep.subr.mxu0 %v3841_v1  ;;  %v3520_v52 = vld [vmem:[%s5159_s0 + $0x38] ss:$16 sps:$4 sm:$0xff]  }
  0x65   :  { %1121 = vmatprep.subr.mxu1 %v3841_v1  ;;  %457 = vmatmul.mubr.f32.gmra.mxu0 %v333_v54  ;;  %v1378_v53 = vld [vmem:[#allocation3 + $0x2e8] sm:$0xff] }
  0x66   :  { %867 = vmatpush1.msra.mxu0 %v776_v55  ;;  %1122 = vmatpush1.msra.mxu1 %v1031_v59  ;;  %v1712_v54 = vld [vmem:[#allocation3 + $0x388] sm:$0xff]  ;;  %v730_v55 = vsel %vm4165_vm6, %v3032_v39, %v729_v41  ;;  %v737_v59 = vrot.slane %v3532_v44, 6  ;;  %v3559_v44 = vld [vmem:[%s5159_s0 + $0x134] ss:$8 sps:$4 sm:$0x33]  }
  0x67   :  { %3026 = vmatprep.mubr.msk.f32.mxu1 %vm345_vm3, %v3496_v56  ;;  %892 = vmatprep.subr.mxu0 %v3841_v1  ;;  %v734_v56 = vsel %vm4165_vm6, %v3033_v42, %v733_v45  ;;  %v3554_v39 = vld [vmem:[%s5159_s0 + $0x120] ss:$8 sps:$4 sm:$0xcc]   ;;  %v3556_v41 = vld [vmem:[%s5159_s0 + $0x124] ss:$8 sps:$4 sm:$0x33]  }
  0x68   :  { %1147 = vmatprep.subr.mxu1 %v3841_v1  ;;  %602 = vmatmul.mubr.f32.gmra.mxu1 %v3497_v60  ;;  %v3035_v60 = vrot.slane %v3533_v46, 10  ;;  %v800_v5 = vcombine.low %v730_v55, %v734_v56  ;;  %v738_v11 = vsel %vm4165_vm6, %v3034_v58, %v737_v59  ;;  %v3544_v45 = vld [vmem:[%s5159_s0 + $0xd8] ss:$16 sps:$4 sm:$0xff]  }
  0x69   :  { %893 = vmatpush2.msra.mxu0 %v795_v0  ;;  %1148 = vmatpush2.msra.mxu1 %v1050_v2  ;;  %v801_v0 = vcombine.high %v730_v55, %v734_v56  ;;  %v1377_v2 = vld [vmem:[#allocation3 + $0x2e0] sm:$0xff]  ;;  %v1372_v46 = vld [vmem:[#allocation3 + $0x2b8] sm:$0xff]  ;;  %v765_v55 = vrot.slane %v3559_v44, 6 }
  0x6a   :  { %3003 = vmatprep.mubr.msk.f32.mxu0 %vm345_vm3, %v336_v7  ;;  %894 = vmatprep.subr.mxu0 %v3841_v1  ;;  %v3528_v7 = vld [vmem:[%s5159_s0 + $0x78] ss:$16 sps:$4 sm:$0xff]  }
  0x6b   :  { %1149 = vmatprep.subr.mxu1 %v3841_v1  ;;  %462 = vmatmul.mubr.f32.gmra.mxu0 %v335_v12  ;;  %v742_v12 = vsel %vm4165_vm6, %v3035_v60, %v741_v61  ;;  %v3562_v59 = vld [vmem:[%s5159_s0 + $0x140] ss:$8 sps:$4 sm:$0xcc]   ;;  %v3564_v60 = vld [vmem:[%s5159_s0 + $0x144] ss:$8 sps:$4 sm:$0x33]  }
  0x6c   :  { %895 = vmatpush2.msra.mxu0 %v794_v13  ;;  %1150 = vmatpush2.msra.mxu1 %v1049_v14  ;;  %v1710_v13 = vld [vmem:[#allocation3 + $0x378] sm:$0xff]  ;;  %v3036_v14 = vrot.slane %v3538_v62, 10  ;;  %v802_v24 = vcombine.low %v738_v11, %v742_v12  ;;  %v1370_v61 = vld [vmem:[#allocation3 + $0x2a8] sm:$0xff]  ;;  %v3042_v6 = vrot.slane %v3562_v59, 10 }
  0x6d   :  { %3027 = vmatprep.mubr.msk.f32.mxu1 %vm345_vm3, %v3504_v15  ;;  %896 = vmatprep.subr.mxu0 %v3841_v1  ;;  %v1375_v15 = vld [vmem:[#allocation3 + $0x2d0] sm:$0xff]  ;;  %v1384_v44 = vld [vmem:[#allocation3 + $0x318] sm:$0xff]  ;;  %v1716_v59 = vld [vmem:[#allocation3 + $0x3a8] sm:$0xff] }
  0x6e   :  { %1151 = vmatprep.subr.mxu1 %v3841_v1  ;;  %607 = vmatmul.mubr.f32.gmra.mxu1 %v3505_v16  ;;  %v745_v16 = vrot.slane %v3540_v63, 6  ;;  %v3565_v62 = vld [vmem:[%s5159_s0 + $0x150] ss:$8 sps:$4 sm:$0xcc]  }
  0x6f   :  { %897 = vmatpush2.msra.mxu0 %v793_v19  ;;  %1152 = vmatpush2.msra.mxu1 %v1048_v20  ;;  %v3546_v19 = vld [vmem:[%s5159_s0 + $0xe0] ss:$8 sps:$4 sm:$0xcc]   ;;  %v803_v20 = vcombine.high %v738_v11, %v742_v12  ;;  %v3567_v63 = vld [vmem:[%s5159_s0 + $0x154] ss:$8 sps:$4 sm:$0x33]  }
  0x70   :  { %898 = vmatprep.subr.mxu0 %v3841_v1  ;;  %1153 = vmatprep.subr.mxu1 %v3841_v1  ;;  %v1369_v12 = vld [vmem:[#allocation3 + $0x2a0] sm:$0xff] }
  0x71   :  { %899 = vmatpush2.msra.mxu0 %v792_v29  ;;  %3044 = vmatprep.mubr.msk.f32.mxu0 %vm345_vm3, %v797_v30  ;;  %v3537_v29 = vld [vmem:[%s5159_s0 + $0x90] ss:$16 sps:$4 sm:$0xff]   ;;  %v746_v30 = vsel %vm4165_vm6, %v3036_v14, %v745_v16 }
  0x72   :  { %1154 = vmatpush2.msra.mxu1 %v1047_v32  ;;  %901 = vmatmul.mubr.f32.vlgmr.msra.gmra.mxu0 %v796_v31  ;;  %v750_v31 = vsel %vm4165_vm6, %v3037_v17, %v749_v18  ;;  %v3038_v32 = vrot.slane %v3546_v19, 10  ;;  %v1703_v14 = vld [vmem:[#allocation3 + $0x340] sm:$0xff]  ;;  %v1368_v16 = vld [vmem:[#allocation3 + $0x298] sm:$0xff] }
  0x73   :  { %3100 = vmatprep.mubr.msk.f32.mxu1 %vm345_vm3, %v3512_v33  ;;  %1425 = vmatprep.subr.mxu0 %v3841_v1  ;;  %v753_v33 = vrot.slane %v3548_v21, 6  ;;  %v804_v42 = vcombine.low %v746_v30, %v750_v31  ;;  %v1702_v17 = vld [vmem:[#allocation3 + $0x338] sm:$0xff]  ;;  %v1367_v21 = vld [vmem:[#allocation3 + $0x290] sm:$0xff] }
  0x74   :  { %1759 = vmatprep.subr.mxu1 %v3841_v1  ;;  %1156 = vmatmul.mubr.f32.vlgmr.msra.gmra.mxu1 %v3513_v35  ;;  %v3039_v35 = vrot.slane %v3549_v22, 10  ;;  %v4375_v22 = vld [vmem:[%s5159_s0 + $0x10] ss:$8 sps:$4 sm:$0xee]  }
  0x75   :  { %1426 = vmatpush1.msra.mxu0 %v1380_v36  ;;  %1760 = vmatpush1.msra.mxu1 %v1714_v37  ;;  %v757_v36 = vrot.slane %v3551_v25, 6  ;;  %v805_v37 = vcombine.high %v746_v30, %v750_v31  ;;  %v754_v49 = vsel %vm4165_vm6, %v3038_v32, %v753_v33  ;;  %v3573_v25 = vld [vmem:[%s5159_s0 + $0x20] ss:$8 sps:$4 sm:$0xee]   ;;  %v3140_v33 = vrot.slane %v4375_v22, 9 }
  0x76   :  { %1427 = vmatprep.subr.mxu0 %v3841_v1  ;;  %1761 = vmatprep.subr.mxu1 %v3841_v1  ;;  %v1366_v30 = vld [vmem:[#allocation3 + $0x288] sm:$0xff] }
  0x77   :  { %3045 = vmatprep.mubr.msk.f32.mxu0 %vm345_vm3, %v799_v47  ;;  %1428 = vmatpush1.msra.mxu0 %v1379_v48  ;;  %v1706_v47 = vld [vmem:[#allocation3 + $0x358] sm:$0xff]  ;;  %v1700_v31 = vld [vmem:[#allocation3 + $0x328] sm:$0xff] }
  0x78   :  { %1762 = vmatpush1.msra.mxu1 %v1713_v50  ;;  %906 = vmatmul.mubr.f32.gmra.mxu0 %v798_v51  ;;  %v3545_v48 = vld [vmem:[%s5159_s0 + $0xd0] ss:$16 sps:$4 sm:$0xff]   ;;  %v758_v50 = vsel %vm4165_vm6, %v3039_v35, %v757_v36  ;;  %v3040_v51 = vrot.slane %v3554_v39, 10  ;;  %v3578_v35 = vld [vmem:[%s5159_s0 + $0x14] ss:$8 sps:$4 sm:$0x33]  }
  0x79   :  { %1429 = vmatprep.subr.mxu0 %v3841_v1  ;;  %1763 = vmatprep.subr.mxu1 %v3841_v1  ;;  %v807_v56 = vcombine.high %v754_v49, %v758_v50  ;;  %v806_v58 = vcombine.low %v754_v49, %v758_v50  ;;  %v3569_v32 = vld [vmem:[%s5159_s0 + $0x150] ss:$16 sps:$4 sm:$0xff]  }
  0x7a   :  { %3101 = vmatprep.mubr.msk.f32.mxu1 %vm345_vm3, %v3520_v52  ;;  %1430 = vmatpush1.msra.mxu0 %v1378_v53  ;;  %v761_v52 = vrot.slane %v3556_v41, 6  ;;  %v1371_v53 = vld [vmem:[#allocation3 + $0x2b0] sm:$0xff]  ;;  %v3579_v36 = vld [vmem:[%s5159_s0 + $0x20] ss:$8 sps:$4 sm:$0xcc]  }
  0x7b   :  { %1764 = vmatpush1.msra.mxu1 %v1712_v54  ;;  %1431 = vmatprep.subr.mxu0 %v3841_v1  ;;  %v3041_v54 = vrot.slane %v3557_v43, 10  ;;  %v3581_v41 = vld [vmem:[%s5159_s0 + $0x24] ss:$8 sps:$4 sm:$0x33]   ;;  %v1383_v50 = vld [vmem:[#allocation3 + $0x310] sm:$0xff] }
  0x7c   :  { %1161 = vmatmul.mubr.f32.gmra.mxu1 %v3521_v57  ;;  %1765 = vmatprep.subr.mxu1 %v3841_v1  ;;  %v1705_v57 = vld [vmem:[#allocation3 + $0x350] sm:$0xff]  ;;  %v762_v3 = vsel %vm4165_vm6, %v3040_v51, %v761_v52  ;;  %v3585_v49 = vld [vmem:[%s5159_s0 + $0x40] ss:$8 sps:$4 sm:$0xee]   ;;  %v1636_v52 = vrot.slane %v3578_v35, 6 }
  0x7d   :  { %3046 = vmatprep.mubr.msk.f32.mxu0 %vm345_vm3, %v801_v0  ;;  %1432 = vmatpush1.msra.mxu0 %v1377_v2  ;;  %v3552_v0 = vld [vmem:[%s5159_s0 + $0xf8] ss:$16 sps:$4 sm:$0xff]  }
  0x7e   :  { %1766 = vmatpush1.msra.mxu1 %v1711_v4  ;;  %911 = vmatmul.mubr.f32.gmra.mxu0 %v800_v5  ;;  %v1704_v2 = vld [vmem:[#allocation3 + $0x348] sm:$0xff]  ;;  %v766_v4 = vsel %vm4165_vm6, %v3041_v54, %v765_v55  ;;  %v1717_v51 = vld [vmem:[#allocation3 + $0x3b0] sm:$0xff]  ;;  %v1640_v54 = vrot.slane %v3581_v41, 6 }
  0x7f   :  { %1433 = vmatprep.subr.mxu0 %v3841_v1  ;;  %1767 = vmatprep.subr.mxu1 %v3841_v1  ;;  %v3553_v5 = vld [vmem:[%s5159_s0 + $0xf0] ss:$16 sps:$4 sm:$0xff]   ;;  %v809_v11 = vcombine.high %v762_v3, %v766_v4  ;;  %v3587_v55 = vld [vmem:[%s5159_s0 + $0x44] ss:$8 sps:$4 sm:$0x11]  }
  0x80   :  { %3102 = vmatprep.mubr.msk.f32.mxu1 %vm345_vm3, %v3528_v7  ;;  %1434 = vmatpush1.msra.mxu0 %v1376_v9  ;;  %v769_v7 = vrot.slane %v3564_v60, 6  ;;  %v3043_v9 = vrot.slane %v3565_v62, 10  ;;  %v3143_v62 = vrot.slane %v3585_v49, 9  ;;  %v3597_v22 = vld [vmem:[%s5159_s0 + $0x80] ss:$8 sps:$4 sm:$0xee]  }
  0x81   :  { %1768 = vmatpush1.msra.mxu1 %v1710_v13  ;;  %1435 = vmatprep.subr.mxu0 %v3841_v1  ;;  %v808_v13 = vcombine.low %v762_v3, %v766_v4  ;;  %v1381_v3 = vld [vmem:[#allocation3 + $0x300] sm:$0xff]  ;;  %v1967_v41 = vld [vmem:[#allocation3 + $0x428] sm:$0xff] }
  0x82   :  { %1166 = vmatmul.mubr.f32.gmra.mxu1 %v3529_v10  ;;  %1769 = vmatprep.subr.mxu1 %v3841_v1  ;;  %v773_v10 = vrot.slane %v3567_v63, 6  ;;  %v770_v18 = vsel %vm4165_vm6, %v3042_v6, %v769_v7  ;;  %v1314_v63 = vrot.slane %v3587_v55, 5  ;;  %v3591_v6 = vld [vmem:[%s5159_s0 + $0x40] ss:$8 sps:$4 sm:$0xcc]  }
  0x83   :  { %3047 = vmatprep.mubr.msk.f32.mxu0 %vm345_vm3, %v803_v20  ;;  %1436 = vmatpush1.msra.mxu0 %v1375_v15  ;;  %v3560_v15 = vld [vmem:[%s5159_s0 + $0x138] ss:$16 sps:$4 sm:$0xff]   ;;  %v3561_v20 = vld [vmem:[%s5159_s0 + $0x130] ss:$16 sps:$4 sm:$0xff]  }
  0x84   :  { %1770 = vmatpush1.msra.mxu1 %v1709_v23  ;;  %916 = vmatmul.mubr.f32.gmra.mxu0 %v802_v24  ;;  %v774_v19 = vsel %vm4165_vm6, %v3043_v9, %v773_v10  ;;  %v3572_v23 = vld [vmem:[%s5159_s0 + $0x14] ss:$8 sps:$4 sm:$0x11]   ;;  %v3593_v7 = vld [vmem:[%s5159_s0 + $0x44] ss:$8 sps:$4 sm:$0x33]  }
  0x85   :  { %1437 = vmatprep.subr.mxu0 %v3841_v1  ;;  %1771 = vmatprep.subr.mxu1 %v3841_v1  ;;  %v811_v24 = vcombine.high %v770_v18, %v774_v19  ;;  %v1302_v39 = vrot.slane %v3572_v23, 5  ;;  %v1715_v10 = vld [vmem:[#allocation3 + $0x3a0] sm:$0xff] }
  0x86   :  { %3103 = vmatprep.mubr.msk.f32.mxu1 %vm345_vm3, %v3536_v26  ;;  %1438 = vmatpush1.msra.mxu0 %v1374_v27  ;;  %v3575_v26 = vld [vmem:[%s5159_s0 + $0x24] ss:$8 sps:$4 sm:$0x11]   ;;  %v1701_v27 = vld [vmem:[#allocation3 + $0x330] sm:$0xff] }
  0x87   :  { %1772 = vmatpush1.msra.mxu1 %v1708_v28  ;;  %1439 = vmatprep.subr.mxu0 %v3841_v1  ;;  %v810_v28 = vcombine.low %v770_v18, %v774_v19  ;;  %v1306_v43 = vrot.slane %v3575_v26, 5  ;;  %v1303_v60 = vsel %vm3922_vm2, %v3140_v33, %v1302_v39  ;;  %v3596_v18 = vld [vmem:[%s5159_s0 + $0x74] ss:$8 sps:$4 sm:$0x11]   ;;  %v2300_v55 = vld [vmem:[#allocation3 + $0x4c0] sm:$0xff] }
  0x88   :  { %1171 = vmatmul.mubr.f32.gmra.mxu1 %v3537_v29  ;;  %1773 = vmatprep.subr.mxu1 %v3841_v1  ;;  %v3568_v29 = vld [vmem:[%s5159_s0 + $0x158] ss:$16 sps:$4 sm:$0xff]   ;;  %v3599_v23 = vld [vmem:[%s5159_s0 + $0x84] ss:$8 sps:$4 sm:$0x11]  }
  0x89   :  { %3048 = vmatprep.mubr.msk.f32.mxu0 %vm345_vm3, %v805_v37  ;;  %1440 = vmatpush1.msra.mxu0 %v1373_v34  ;;  %v3576_v34 = vld [vmem:[%s5159_s0 + $0x10] ss:$8 sps:$4 sm:$0xcc]   ;;  %v1365_v37 = vld [vmem:[#allocation3 + $0x280] sm:$0xff] }
  0x8a   :  { %1774 = vmatpush1.msra.mxu1 %v1707_v38  ;;  %921 = vmatmul.mubr.f32.gmra.mxu0 %v804_v42  ;;  %v1699_v38 = vld [vmem:[#allocation3 + $0x320] sm:$0xff]  ;;  %v3141_v42 = vrot.slane %v3573_v25, 9  ;;  %v2303_v25 = vld [vmem:[#allocation3 + $0x4d8] sm:$0xff]  ;;  %v1968_v33 = vld [vmem:[#allocation3 + $0x430] sm:$0xff] }
  0x8b   :  { %1441 = vmatprep.subr.mxu0 %v3841_v1  ;;  %1775 = vmatprep.subr.mxu1 %v3841_v1 }
  0x8c   :  { %3104 = vmatprep.mubr.msk.f32.mxu1 %vm345_vm3, %v3544_v45  ;;  %1442 = vmatpush1.msra.mxu0 %v1372_v46  ;;  %v1718_v45 = vld [vmem:[#allocation3 + $0x3b8] sm:$0xff]  ;;  %v3196_v46 = vrot.slane %v3576_v34, 10 }
  0x8d   :  { %1776 = vmatpush1.msra.mxu1 %v1706_v47  ;;  %1443 = vmatprep.subr.mxu0 %v3841_v1  ;;  %v3582_v47 = vld [vmem:[%s5159_s0 + $0x30] ss:$8 sps:$4 sm:$0xee]  }
  0x8e   :  { %1176 = vmatmul.mubr.f32.gmra.mxu1 %v3545_v48  ;;  %1777 = vmatprep.subr.mxu1 %v3841_v1  ;;  %v3584_v48 = vld [vmem:[%s5159_s0 + $0x34] ss:$8 sps:$4 sm:$0x11]   ;;  %v1637_v4 = vsel %vm4165_vm6, %v3196_v46, %v1636_v52  ;;  %v3600_v34 = vld [vmem:[%s5159_s0 + $0x70] ss:$8 sps:$4 sm:$0xcc]  }
  0x8f   :  { %3049 = vmatprep.mubr.msk.f32.mxu0 %vm345_vm3, %v807_v56  ;;  %1444 = vmatpush1.msra.mxu0 %v1371_v53  ;;  %v3197_v53 = vrot.slane %v3579_v36, 10  ;;  %v3142_v56 = vrot.slane %v3582_v47, 9  ;;  %v3602_v36 = vld [vmem:[%s5159_s0 + $0x74] ss:$8 sps:$4 sm:$0x33]  }
  0x90   :  { %1778 = vmatpush1.msra.mxu1 %v1705_v57  ;;  %926 = vmatmul.mubr.f32.gmra.mxu0 %v806_v58  ;;  %v1310_v57 = vrot.slane %v3584_v48, 5  ;;  %v1382_v58 = vld [vmem:[#allocation3 + $0x308] sm:$0xff]  ;;  %v1652_v46 = vrot.slane %v3602_v36, 6  ;;  %v3606_v52 = vld [vmem:[%s5159_s0 + $0x90] ss:$8 sps:$4 sm:$0xee]  }
  0x91   :  { %1445 = vmatprep.subr.mxu0 %v3841_v1  ;;  %1779 = vmatprep.subr.mxu1 %v3841_v1  ;;  %v2301_v48 = vld [vmem:[#allocation3 + $0x4c8] sm:$0xff] }
  0x92   :  { %3105 = vmatprep.mubr.msk.f32.mxu1 %vm345_vm3, %v3552_v0  ;;  %1446 = vmatpush1.msra.mxu0 %v1370_v61  ;;  %v1307_v61 = vsel %vm3922_vm2, %v3141_v42, %v1306_v43  ;;  %v3588_v0 = vld [vmem:[%s5159_s0 + $0x30] ss:$8 sps:$4 sm:$0xcc]   ;;  %v3605_v42 = vld [vmem:[%s5159_s0 + $0x84] ss:$8 sps:$4 sm:$0x33]  }
  0x93   :  { %1780 = vmatpush1.msra.mxu1 %v1704_v2  ;;  %1447 = vmatprep.subr.mxu0 %v3841_v1  ;;  %v3590_v2 = vld [vmem:[%s5159_s0 + $0x34] ss:$8 sps:$4 sm:$0x33]   ;;  %v1386_v9 = vcombine.high %v1303_v60, %v1307_v61  ;;  %v3200_v43 = vrot.slane %v3600_v34, 10  ;;  %v1656_v49 = vrot.slane %v3605_v42, 6 }
  0x94   :  { %1181 = vmatmul.mubr.f32.gmra.mxu1 %v3553_v5  ;;  %1781 = vmatprep.subr.mxu1 %v3841_v1  ;;  %v1641_v5 = vsel %vm4165_vm6, %v3197_v53, %v1640_v54  ;;  %v3608_v53 = vld [vmem:[%s5159_s0 + $0x94] ss:$8 sps:$4 sm:$0x11]   ;;  %v3627_v42 = vld [vmem:[%s5159_s0 + $0xe0] ss:$8 sps:$4 sm:$0xcc]  }
  0x95   :  { %3050 = vmatprep.mubr.msk.f32.mxu0 %vm345_vm3, %v809_v11  ;;  %1448 = vmatpush1.msra.mxu0 %v1369_v12  ;;  %v3198_v11 = vrot.slane %v3588_v0, 10  ;;  %v1644_v12 = vrot.slane %v3590_v2, 6  ;;  %v1719_v19 = vcombine.low %v1637_v4, %v1641_v5 }
  0x96   :  { %1782 = vmatpush1.msra.mxu1 %v1703_v14  ;;  %931 = vmatmul.mubr.f32.gmra.mxu0 %v808_v13  ;;  %v1385_v13 = vcombine.low %v1303_v60, %v1307_v61  ;;  %v3199_v14 = vrot.slane %v3591_v6, 10  ;;  %v3146_v61 = vrot.slane %v3606_v52, 9  ;;  %v3614_v6 = vld [vmem:[%s5159_s0 + $0x94] ss:$8 sps:$4 sm:$0x33]  }
  0x97   :  { %1449 = vmatprep.subr.mxu0 %v3841_v1  ;;  %1783 = vmatprep.subr.mxu1 %v3841_v1 }
  0x98   :  { %3106 = vmatprep.mubr.msk.f32.mxu1 %vm345_vm3, %v3560_v15  ;;  %1450 = vmatpush1.msra.mxu0 %v1368_v16  ;;  %v1648_v15 = vrot.slane %v3593_v7, 6  ;;  %v1720_v16 = vcombine.high %v1637_v4, %v1641_v5  ;;  %v3612_v5 = vld [vmem:[%s5159_s0 + $0x90] ss:$8 sps:$4 sm:$0xcc]  }
  0x99   :  { %1784 = vmatpush1.msra.mxu1 %v1702_v17  ;;  %1451 = vmatprep.subr.mxu0 %v3841_v1  ;;  %v3594_v17 = vld [vmem:[%s5159_s0 + $0x70] ss:$8 sps:$4 sm:$0xee]  }
  0x9a   :  { %1186 = vmatmul.mubr.f32.gmra.mxu1 %v3561_v20  ;;  %1785 = vmatprep.subr.mxu1 %v3841_v1  ;;  %v1311_v20 = vsel %vm3922_vm2, %v3142_v56, %v1310_v57  ;;  %v3144_v26 = vrot.slane %v3594_v17, 9  ;;  %v1653_v56 = vsel %vm4165_vm6, %v3200_v43, %v1652_v46  ;;  %v3629_v43 = vld [vmem:[%s5159_s0 + $0xe4] ss:$8 sps:$4 sm:$0x33]  }
  0x9b   :  { %3051 = vmatprep.mubr.msk.f32.mxu0 %vm345_vm3, %v811_v24  ;;  %1452 = vmatpush1.msra.mxu0 %v1367_v21  ;;  %v1315_v21 = vsel %vm3922_vm2, %v3143_v62, %v1314_v63  ;;  %v1969_v24 = vld [vmem:[#allocation3 + $0x438] sm:$0xff]  ;;  %v1326_v62 = vrot.slane %v3608_v53, 5 }
  0x9c   :  { %1786 = vmatpush1.msra.mxu1 %v1701_v27  ;;  %936 = vmatmul.mubr.f32.gmra.mxu0 %v810_v28  ;;  %v1318_v27 = vrot.slane %v3596_v18, 5  ;;  %v1645_v28 = vsel %vm4165_vm6, %v3198_v11, %v1644_v12  ;;  %v1387_v35 = vcombine.low %v1311_v20, %v1315_v21  ;;  %v1965_v63 = vld [vmem:[#allocation3 + $0x418] sm:$0xff] }
  0x9d   :  { %1453 = vmatprep.subr.mxu0 %v3841_v1  ;;  %1787 = vmatprep.subr.mxu1 %v3841_v1  ;;  %v1327_v4 = vsel %vm3922_vm2, %v3146_v61, %v1326_v62  ;;  %v2299_v11 = vld [vmem:[#allocation3 + $0x4b8] sm:$0xff]  ;;  %v1960_v62 = vld [vmem:[#allocation3 + $0x3f0] sm:$0xff] }
  0x9e   :  { %3107 = vmatprep.mubr.msk.f32.mxu1 %vm345_vm3, %v3568_v29  ;;  %1454 = vmatpush1.msra.mxu0 %v1366_v30  ;;  %v1649_v29 = vsel %vm4165_vm6, %v3199_v14, %v1648_v15  ;;  %v3145_v30 = vrot.slane %v3597_v22, 9  ;;  %v3202_v14 = vrot.slane %v3612_v5, 10  ;;  %v1660_v15 = vrot.slane %v3614_v6, 6  ;;  %v3618_v22 = vld [vmem:[%s5159_s0 + $0xd0] ss:$8 sps:$4 sm:$0xee]  }
  0x9f   :  { %1788 = vmatpush1.msra.mxu1 %v1700_v31  ;;  %1455 = vmatprep.subr.mxu0 %v3841_v1  ;;  %v1322_v31 = vrot.slane %v3599_v23, 5  ;;  %v1722_v39 = vcombine.high %v1645_v28, %v1649_v29  ;;  %v3630_v53 = vld [vmem:[%s5159_s0 + $0xf0] ss:$8 sps:$4 sm:$0xee]   ;;  %v1959_v5 = vld [vmem:[#allocation3 + $0x3e8] sm:$0xff] }
  0xa0   :  { %1191 = vmatmul.mubr.f32.gmra.mxu1 %v3569_v32  ;;  %1789 = vmatprep.subr.mxu1 %v3841_v1  ;;  %v1388_v32 = vcombine.high %v1311_v20, %v1315_v21  ;;  %v1661_v21 = vsel %vm4165_vm6, %v3202_v14, %v1660_v15  ;;  %v2293_v14 = vld [vmem:[#allocation3 + $0x488] sm:$0xff]  ;;  %v1958_v15 = vld [vmem:[#allocation3 + $0x3e0] sm:$0xff] }
  0xa1   :  { %1456 = vmatpush1.msra.mxu0 %v1365_v37  ;;  %1790 = vmatpush1.msra.mxu1 %v1699_v38  ;;  %v3603_v37 = vld [vmem:[%s5159_s0 + $0x80] ss:$8 sps:$4 sm:$0xcc]   ;;  %v2302_v38 = vld [vmem:[#allocation3 + $0x4d0] sm:$0xff] }
  0xa2   :  { %1481 = vmatprep.subr.mxu0 %v3841_v1  ;;  %1815 = vmatprep.subr.mxu1 %v3841_v1  ;;  %v3201_v47 = vrot.slane %v3603_v37, 10  ;;  %v2296_v37 = vld [vmem:[#allocation3 + $0x4a0] sm:$0xff] }
  0xa3   :  { %1482 = vmatpush2.msra.mxu0 %v1384_v44  ;;  %1816 = vmatpush2.msra.mxu1 %v1718_v45  ;;  %v1319_v44 = vsel %vm3922_vm2, %v3144_v26, %v1318_v27  ;;  %v1323_v45 = vsel %vm3922_vm2, %v3145_v30, %v1322_v31  ;;  %v1963_v27 = vld [vmem:[#allocation3 + $0x408] sm:$0xff]  ;;  %v3148_v30 = vrot.slane %v3618_v22, 9  ;;  %v3644_v22 = vld [vmem:[%s5159_s0 + $0x134] ss:$8 sps:$4 sm:$0x11]  }
  0xa4   :  { %1483 = vmatprep.subr.mxu0 %v3841_v1  ;;  %1817 = vmatprep.subr.mxu1 %v3841_v1  ;;  %v1390_v54 = vcombine.high %v1319_v44, %v1323_v45  ;;  %v1657_v57 = vsel %vm4165_vm6, %v3201_v47, %v1656_v49  ;;  %v1389_v60 = vcombine.low %v1319_v44, %v1323_v45  ;;  %v2295_v49 = vld [vmem:[#allocation3 + $0x498] sm:$0xff] }
  0xa5   :  { %1484 = vmatpush2.msra.mxu0 %v1383_v50  ;;  %1818 = vmatpush2.msra.mxu1 %v1717_v51  ;;  %v1721_v50 = vcombine.low %v1645_v28, %v1649_v29  ;;  %v1966_v51 = vld [vmem:[#allocation3 + $0x420] sm:$0xff]  ;;  %v1723_v12 = vcombine.low %v1653_v56, %v1657_v57  ;;  %v2297_v28 = vld [vmem:[#allocation3 + $0x4a8] sm:$0xff] }
  0xa6   :  { %1485 = vmatprep.subr.mxu0 %v3841_v1  ;;  %1819 = vmatprep.subr.mxu1 %v3841_v1  ;;  %v3623_v29 = vld [vmem:[%s5159_s0 + $0xe4] ss:$8 sps:$4 sm:$0x11]  }
  0xa7   :  { %1486 = vmatpush2.msra.mxu0 %v1382_v58  ;;  %1820 = vmatpush2.msra.mxu1 %v1716_v59  ;;  %v3609_v58 = vld [vmem:[%s5159_s0 + $0xa0] ss:$8 sps:$4 sm:$0xee]   ;;  %v3611_v59 = vld [vmem:[%s5159_s0 + $0xa4] ss:$8 sps:$4 sm:$0x11]  }
  0xa8   :  { %1487 = vmatprep.subr.mxu0 %v3841_v1  ;;  %1821 = vmatprep.subr.mxu1 %v3841_v1  ;;  %v3147_v0 = vrot.slane %v3609_v58, 9  ;;  %v1330_v2 = vrot.slane %v3611_v59, 5  ;;  %v1338_v34 = vrot.slane %v3623_v29, 5  ;;  %v1350_v29 = vrot.slane %v3644_v22, 5 }
  0xa9   :  { %1488 = vmatpush2.msra.mxu0 %v1381_v3  ;;  %3156 = vmatprep.mubr.msk.f32.mxu0 %vm345_vm3, %v1386_v9  ;;  %v1724_v3 = vcombine.high %v1653_v56, %v1657_v57  ;;  %v3615_v9 = vld [vmem:[%s5159_s0 + $0xa0] ss:$8 sps:$4 sm:$0xcc]   ;;  %v3635_v57 = vld [vmem:[%s5159_s0 + $0x104] ss:$8 sps:$4 sm:$0x11]  }
  0xaa   :  { %1822 = vmatpush2.msra.mxu1 %v1715_v10  ;;  %1490 = vmatmul.mubr.f32.vlgmr.msra.gmra.mxu0 %v1385_v13  ;;  %v1331_v7 = vsel %vm3922_vm2, %v3147_v0, %v1330_v2  ;;  %v3617_v10 = vld [vmem:[%s5159_s0 + $0xa4] ss:$8 sps:$4 sm:$0x33]   ;;  %v1964_v13 = vld [vmem:[#allocation3 + $0x410] sm:$0xff]  ;;  %v3203_v17 = vrot.slane %v3615_v9, 10  ;;  %v1346_v2 = vrot.slane %v3635_v57, 5 }
  0xab   :  { %3212 = vmatprep.mubr.msk.f32.mxu1 %vm345_vm3, %v1720_v16  ;;  %2014 = vmatprep.subr.mxu0 %v3841_v1  ;;  %v1392_v16 = vcombine.high %v1327_v4, %v1331_v7  ;;  %v1664_v18 = vrot.slane %v3617_v10, 6  ;;  %v1391_v20 = vcombine.low %v1327_v4, %v1331_v7  ;;  %v3633_v56 = vld [vmem:[%s5159_s0 + $0x100] ss:$8 sps:$4 sm:$0xee]   ;;  %v2290_v57 = vld [vmem:[#allocation3 + $0x470] sm:$0xff] }
  0xac   :  { %2348 = vmatprep.subr.mxu1 %v3841_v1  ;;  %1824 = vmatmul.mubr.f32.vlgmr.msra.gmra.mxu1 %v1719_v19  ;;  %v2298_v19 = vld [vmem:[#allocation3 + $0x4b0] sm:$0xff]  ;;  %v3151_v0 = vrot.slane %v3633_v56, 9  ;;  %v3639_v9 = vld [vmem:[%s5159_s0 + $0x100] ss:$8 sps:$4 sm:$0xcc]  }
  0xad   :  { %2015 = vmatpush1.msra.mxu0 %v1969_v24  ;;  %2349 = vmatpush1.msra.mxu1 %v2303_v25  ;;  %v1665_v23 = vsel %vm4165_vm6, %v3203_v17, %v1664_v18  ;;  %v3620_v24 = vld [vmem:[%s5159_s0 + $0xd4] ss:$8 sps:$4 sm:$0x11]   ;;  %v3621_v25 = vld [vmem:[%s5159_s0 + $0xe0] ss:$8 sps:$4 sm:$0xee]  }
  0xae   :  { %2016 = vmatprep.subr.mxu0 %v3841_v1  ;;  %2350 = vmatprep.subr.mxu1 %v3841_v1  ;;  %v1726_v26 = vcombine.high %v1661_v21, %v1665_v23  ;;  %v1334_v31 = vrot.slane %v3620_v24, 5  ;;  %v3636_v4 = vld [vmem:[%s5159_s0 + $0xf0] ss:$8 sps:$4 sm:$0xcc]   ;;  %v1347_v6 = vsel %vm3922_vm2, %v3151_v0, %v1346_v2  ;;  %v3207_v17 = vrot.slane %v3639_v9, 10 }
  0xaf   :  { %3157 = vmatprep.mubr.msk.f32.mxu0 %vm345_vm3, %v1388_v32  ;;  %2017 = vmatpush1.msra.mxu0 %v1968_v33  ;;  %v3149_v32 = vrot.slane %v3621_v25, 9  ;;  %v1725_v33 = vcombine.low %v1661_v21, %v1665_v23  ;;  %v3638_v7 = vld [vmem:[%s5159_s0 + $0xf4] ss:$8 sps:$4 sm:$0x33]  }
  0xb0   :  { %2351 = vmatpush1.msra.mxu1 %v2302_v38  ;;  %1495 = vmatmul.mubr.f32.gmra.mxu0 %v1387_v35  ;;  %v1962_v35 = vld [vmem:[#allocation3 + $0x400] sm:$0xff]  ;;  %v1335_v36 = vsel %vm3922_vm2, %v3148_v30, %v1334_v31  ;;  %v3624_v38 = vld [vmem:[%s5159_s0 + $0xd0] ss:$8 sps:$4 sm:$0xcc]  }
  0xb1   :  { %2018 = vmatprep.subr.mxu0 %v3841_v1  ;;  %2352 = vmatprep.subr.mxu1 %v3841_v1  ;;  %v3204_v46 = vrot.slane %v3624_v38, 10  ;;  %v3642_v21 = vld [vmem:[%s5159_s0 + $0x130] ss:$8 sps:$4 sm:$0xee]  }
  0xb2   :  { %3213 = vmatprep.mubr.msk.f32.mxu1 %vm345_vm3, %v1722_v39  ;;  %2019 = vmatpush1.msra.mxu0 %v1967_v41  ;;  %v3626_v39 = vld [vmem:[%s5159_s0 + $0xd4] ss:$8 sps:$4 sm:$0x33]   ;;  %v1339_v41 = vsel %vm3922_vm2, %v3149_v32, %v1338_v34  ;;  %v3645_v24 = vld [vmem:[%s5159_s0 + $0x140] ss:$8 sps:$4 sm:$0xee]  }
  0xb3   :  { %2353 = vmatpush1.msra.mxu1 %v2301_v48  ;;  %2020 = vmatprep.subr.mxu0 %v3841_v1  ;;  %v1394_v44 = vcombine.high %v1335_v36, %v1339_v41  ;;  %v1393_v45 = vcombine.low %v1335_v36, %v1339_v41  ;;  %v1668_v47 = vrot.slane %v3626_v39, 6  ;;  %v1961_v48 = vld [vmem:[#allocation3 + $0x3f8] sm:$0xff]  ;;  %v3647_v25 = vld [vmem:[%s5159_s0 + $0x144] ss:$8 sps:$4 sm:$0x11]   ;;  %v3153_v30 = vrot.slane %v3645_v24, 9 }
  0xb4   :  { %1829 = vmatmul.mubr.f32.gmra.mxu1 %v1721_v50  ;;  %2354 = vmatprep.subr.mxu1 %v3841_v1  ;;  %v3205_v50 = vrot.slane %v3627_v42, 10  ;;  %v1354_v31 = vrot.slane %v3647_v25, 5  ;;  %v3650_v34 = vld [vmem:[%s5159_s0 + $0x134] ss:$8 sps:$4 sm:$0x33]   ;;  %v2305_v24 = vld [vmem:[#allocation3 + $0x4e8] sm:$0xff] }
  0xb5   :  { %3158 = vmatprep.mubr.msk.f32.mxu0 %vm345_vm3, %v1390_v54  ;;  %2021 = vmatpush1.msra.mxu0 %v1966_v51  ;;  %v1672_v51 = vrot.slane %v3629_v43, 6  ;;  %v1669_v52 = vsel %vm4165_vm6, %v3204_v46, %v1668_v47  ;;  %v3632_v54 = vld [vmem:[%s5159_s0 + $0xf4] ss:$8 sps:$4 sm:$0x11]   ;;  %v1684_v42 = vrot.slane %v3650_v34, 6  ;;  %v1970_v25 = vld [vmem:[#allocation3 + $0x440] sm:$0xff] }
  0xb6   :  { %2355 = vmatpush1.msra.mxu1 %v2300_v55  ;;  %1500 = vmatmul.mubr.f32.gmra.mxu0 %v1389_v60  ;;  %v3150_v60 = vrot.slane %v3630_v53, 9  ;;  %v1342_v61 = vrot.slane %v3632_v54, 5  ;;  %v3651_v36 = vld [vmem:[%s5159_s0 + $0x140] ss:$8 sps:$4 sm:$0xcc]   ;;  %v1957_v43 = vld [vmem:[#allocation3 + $0x3d8] sm:$0xff] }
  0xb7   :  { %2022 = vmatprep.subr.mxu0 %v3841_v1  ;;  %2356 = vmatprep.subr.mxu1 %v3841_v1  ;;  %v1673_v55 = vsel %vm4165_vm6, %v3205_v50, %v1672_v51  ;;  %v3656_v51 = vld [vmem:[%s5159_s0 + $0x154] ss:$8 sps:$4 sm:$0x11]   ;;  %v3660_v0 = vld [vmem:[%s5159_s0 + $0x150] ss:$8 sps:$4 sm:$0xcc]  }
  0xb8   :  { %3214 = vmatprep.mubr.msk.f32.mxu1 %vm345_vm3, %v1724_v3  ;;  %2023 = vmatpush1.msra.mxu0 %v1965_v63  ;;  %v1728_v58 = vcombine.high %v1669_v52, %v1673_v55  ;;  %v1727_v59 = vcombine.low %v1669_v52, %v1673_v55  ;;  %v2294_v63 = vld [vmem:[#allocation3 + $0x490] sm:$0xff]  ;;  %v1343_v3 = vsel %vm3922_vm2, %v3150_v60, %v1342_v61  ;;  %v3657_v52 = vld [vmem:[%s5159_s0 + $0x160] ss:$8 sps:$4 sm:$0xee]   ;;  %v3210_v9 = vrot.slane %v3660_v0, 10 }
  0xb9   :  { %2357 = vmatpush1.msra.mxu1 %v2299_v11  ;;  %2024 = vmatprep.subr.mxu0 %v3841_v1  ;;  %v1396_v10 = vcombine.high %v1343_v3, %v1347_v6  ;;  %v1395_v11 = vcombine.low %v1343_v3, %v1347_v6  ;;  %v3659_v55 = vld [vmem:[%s5159_s0 + $0x164] ss:$8 sps:$4 sm:$0x11]   ;;  %v3155_v60 = vrot.slane %v3657_v52, 9 }
  0xba   :  { %1834 = vmatmul.mubr.f32.gmra.mxu1 %v1723_v12  ;;  %2358 = vmatprep.subr.mxu1 %v3841_v1  ;;  %v3641_v12 = vld [vmem:[%s5159_s0 + $0x104] ss:$8 sps:$4 sm:$0x33]   ;;  %v1362_v61 = vrot.slane %v3659_v55, 5 }
  0xbb   :  { %3159 = vmatprep.mubr.msk.f32.mxu0 %vm345_vm3, %v1392_v16  ;;  %2025 = vmatpush1.msra.mxu0 %v1964_v13  ;;  %v3206_v13 = vrot.slane %v3636_v4, 10  ;;  %v1676_v16 = vrot.slane %v3638_v7, 6  ;;  %v1680_v18 = vrot.slane %v3641_v12, 6  ;;  %v3662_v2 = vld [vmem:[%s5159_s0 + $0x154] ss:$8 sps:$4 sm:$0x33]  }
  0xbc   :  { %2359 = vmatpush1.msra.mxu1 %v2298_v19  ;;  %1505 = vmatmul.mubr.f32.gmra.mxu0 %v1391_v20  ;;  %v2292_v19 = vld [vmem:[#allocation3 + $0x480] sm:$0xff]  ;;  %v1363_v3 = vsel %vm3922_vm2, %v3155_v60, %v1362_v61  ;;  %v3687_v0 = vld [vmem:[%s5159_s0 + $0x90] ss:$8 sps:$4 sm:$0xee]  }
  0xbd   :  { %2026 = vmatprep.subr.mxu0 %v3841_v1  ;;  %2360 = vmatprep.subr.mxu1 %v3841_v1  ;;  %v1677_v20 = vsel %vm4165_vm6, %v3206_v13, %v1676_v16  ;;  %v1681_v23 = vsel %vm4165_vm6, %v3207_v17, %v1680_v18  ;;  %v3663_v4 = vld [vmem:[%s5159_s0 + $0x160] ss:$8 sps:$4 sm:$0xcc]   ;;  %v2307_v16 = vld [vmem:[#allocation3 + $0x4f8] sm:$0xff]  ;;  %v1972_v18 = vld [vmem:[#allocation3 + $0x450] sm:$0xff] }
  0xbe   :  { %3215 = vmatprep.mubr.msk.f32.mxu1 %vm345_vm3, %v1726_v26  ;;  %2027 = vmatpush1.msra.mxu0 %v1963_v27  ;;  %v1730_v26 = vcombine.high %v1677_v20, %v1681_v23  ;;  %v1729_v27 = vcombine.low %v1677_v20, %v1681_v23  ;;  %v2288_v12 = vld [vmem:[#allocation3 + $0x460] sm:$0xff]  ;;  %v3211_v13 = vrot.slane %v3663_v4, 10  ;;  %v2306_v20 = vld [vmem:[#allocation3 + $0x4f0] sm:$0xff]  ;;  %v1971_v23 = vld [vmem:[#allocation3 + $0x448] sm:$0xff] }
  0xbf   :  { %2361 = vmatpush1.msra.mxu1 %v2297_v28  ;;  %2028 = vmatprep.subr.mxu0 %v3841_v1  ;;  %v3152_v28 = vrot.slane %v3642_v21, 9 }
  0xc0   :  { %1839 = vmatmul.mubr.f32.gmra.mxu1 %v1725_v33  ;;  %2362 = vmatprep.subr.mxu1 %v3841_v1  ;;  %v3648_v33 = vld [vmem:[%s5159_s0 + $0x130] ss:$8 sps:$4 sm:$0xcc]  }
  0xc1   :  { %3160 = vmatprep.mubr.msk.f32.mxu0 %vm345_vm3, %v1394_v44  ;;  %2029 = vmatpush1.msra.mxu0 %v1962_v35  ;;  %v1351_v32 = vsel %vm3922_vm2, %v3152_v28, %v1350_v29  ;;  %v1355_v35 = vsel %vm3922_vm2, %v3153_v30, %v1354_v31  ;;  %v3208_v41 = vrot.slane %v3648_v33, 10  ;;  %v2291_v44 = vld [vmem:[#allocation3 + $0x478] sm:$0xff]  ;;  %v2304_v28 = vld [vmem:[#allocation3 + $0x4e0] sm:$0xff] }
  0xc2   :  { %2363 = vmatpush1.msra.mxu1 %v2296_v37  ;;  %1510 = vmatmul.mubr.f32.gmra.mxu0 %v1393_v45  ;;  %v3653_v37 = vld [vmem:[%s5159_s0 + $0x144] ss:$8 sps:$4 sm:$0x33]   ;;  %v1398_v38 = vcombine.high %v1351_v32, %v1355_v35  ;;  %v1397_v39 = vcombine.low %v1351_v32, %v1355_v35  ;;  %v3209_v45 = vrot.slane %v3651_v36, 10 }
  0xc3   :  { %2030 = vmatprep.subr.mxu0 %v3841_v1  ;;  %2364 = vmatprep.subr.mxu1 %v3841_v1  ;;  %v1688_v46 = vrot.slane %v3653_v37, 6  ;;  %v1685_v47 = vsel %vm4165_vm6, %v3208_v41, %v1684_v42  ;;  %v3668_v29 = vld [vmem:[%s5159_s0 + $0x20] ss:$8 sps:$4 sm:$0xee]   ;;  %v2637_v37 = vld [vmem:[#allocation3 + $0x578] sm:$0xff] }
  0xc4   :  { %2031 = vmatpush1.msra.mxu0 %v1961_v48  ;;  %2365 = vmatpush1.msra.mxu1 %v2295_v49  ;;  %v3654_v48 = vld [vmem:[%s5159_s0 + $0x150] ss:$8 sps:$4 sm:$0xee]   ;;  %v3670_v30 = vld [vmem:[%s5159_s0 + $0x24] ss:$8 sps:$4 sm:$0x11]  }
  0xc5   :  { %3216 = vmatprep.mubr.msk.f32.mxu1 %vm345_vm3, %v1728_v58  ;;  %2032 = vmatprep.subr.mxu0 %v3841_v1  ;;  %v1956_v49 = vld [vmem:[#allocation3 + $0x3d0] sm:$0xff]  ;;  %v1689_v50 = vsel %vm4165_vm6, %v3209_v45, %v1688_v46  ;;  %v3154_v56 = vrot.slane %v3654_v48, 9  ;;  %v1955_v58 = vld [vmem:[#allocation3 + $0x3c8] sm:$0xff]  ;;  %v3308_v33 = vrot.slane %v3668_v29, 9  ;;  %v2225_v34 = vrot.slane %v3670_v30, 5 }
  0xc6   :  { %1844 = vmatmul.mubr.f32.gmra.mxu1 %v1727_v59  ;;  %2366 = vmatprep.subr.mxu1 %v3841_v1  ;;  %v1732_v53 = vcombine.high %v1685_v47, %v1689_v50  ;;  %v1731_v54 = vcombine.low %v1685_v47, %v1689_v50  ;;  %v1358_v59 = vrot.slane %v3656_v51, 5  ;;  %v3671_v31 = vld [vmem:[%s5159_s0 + $0x30] ss:$8 sps:$4 sm:$0xee]  }
  0xc7   :  { %2033 = vmatpush1.msra.mxu0 %v1960_v62  ;;  %2367 = vmatpush1.msra.mxu1 %v2294_v63  ;;  %v2289_v62 = vld [vmem:[#allocation3 + $0x468] sm:$0xff]  ;;  %v3673_v32 = vld [vmem:[%s5159_s0 + $0x34] ss:$8 sps:$4 sm:$0x11]   ;;  %v3309_v35 = vrot.slane %v3671_v31, 9  ;;  %v2630_v31 = vld [vmem:[#allocation3 + $0x540] sm:$0xff] }
  0xc8   :  { %2034 = vmatprep.subr.mxu0 %v3841_v1  ;;  %2368 = vmatprep.subr.mxu1 %v3841_v1  ;;  %v1359_v63 = vsel %vm3922_vm2, %v3154_v56, %v1358_v59  ;;  %v2229_v36 = vrot.slane %v3673_v32, 5  ;;  %v3675_v41 = vld [vmem:[%s5159_s0 + $0x40] ss:$16 sps:$4 sm:$0xff]   ;;  %v3678_v47 = vld [vmem:[%s5159_s0 + $0x44] ss:$8 sps:$4 sm:$0x11]  }
  0xc9   :  { %3161 = vmatprep.mubr.msk.f32.mxu0 %vm345_vm3, %v1396_v10  ;;  %2035 = vmatpush1.msra.mxu0 %v1959_v5  ;;  %v3665_v5 = vld [vmem:[%s5159_s0 + $0x164] ss:$8 sps:$4 sm:$0x33]   ;;  %v1400_v6 = vcombine.high %v1359_v63, %v1363_v3  ;;  %v1399_v7 = vcombine.low %v1359_v63, %v1363_v3  ;;  %v1692_v10 = vrot.slane %v3662_v2, 6  ;;  %v2636_v45 = vld [vmem:[#allocation3 + $0x570] sm:$0xff]  ;;  %v2233_v52 = vrot.slane %v3678_v47, 5 }
  0xca   :  { %1515 = vmatmul.mubr.f32.gmra.mxu0 %v1395_v11  ;;  %2369 = vmatpush1.msra.mxu1 %v2293_v14  ;;  %v1954_v11 = vld [vmem:[#allocation3 + $0x3c0] sm:$0xff]  ;;  %v1696_v14 = vrot.slane %v3665_v5, 6  ;;  %v2230_v42 = vsel %vm3922_vm2, %v3309_v35, %v2229_v36  ;;  %v3679_v48 = vld [vmem:[%s5159_s0 + $0x50] ss:$8 sps:$4 sm:$0xee]  }
  0xcb   :  { %2036 = vmatprep.subr.mxu0 %v3841_v1  ;;  %2370 = vmatprep.subr.mxu1 %v3841_v1  ;;  %v1693_v17 = vsel %vm4165_vm6, %v3210_v9, %v1692_v10  ;;  %v3676_v46 = vld [vmem:[%s5159_s0 + $0x40] ss:$8 sps:$4 sm:$0xee]   ;;  %v3681_v50 = vld [vmem:[%s5159_s0 + $0x54] ss:$8 sps:$4 sm:$0x11]  }
  0xcc   :  { %2037 = vmatpush1.msra.mxu0 %v1958_v15  ;;  %2371 = vmatpush1.msra.mxu1 %v2292_v19  ;;  %v1973_v15 = vld [vmem:[#allocation3 + $0x458] sm:$0xff]  ;;  %v1697_v19 = vsel %vm4165_vm6, %v3211_v13, %v1696_v14  ;;  %v3310_v51 = vrot.slane %v3676_v46, 9  ;;  %v2237_v55 = vrot.slane %v3681_v50, 5  ;;  %v3686_v63 = vld [vmem:[%s5159_s0 + $0x84] ss:$8 sps:$4 sm:$0x11]  }
  0xcd   :  { %2038 = vmatprep.subr.mxu0 %v3841_v1  ;;  %2372 = vmatprep.subr.mxu1 %v3841_v1  ;;  %v1734_v21 = vcombine.high %v1693_v17, %v1697_v19  ;;  %v1733_v22 = vcombine.low %v1693_v17, %v1697_v19  ;;  %v3689_v2 = vld [vmem:[%s5159_s0 + $0x94] ss:$8 sps:$4 sm:$0x11]   ;;  %v2241_v4 = vrot.slane %v3686_v63, 5  ;;  %v3690_v9 = vld [vmem:[%s5159_s0 + $0xa8] ss:$16 sps:$4 sm:$0xff]  }
  0xce   :  { %3217 = vmatprep.mubr.msk.f32.mxu1 %vm345_vm3, %v1730_v26  ;;  %2039 = vmatpush1.msra.mxu0 %v1957_v43  ;;  %v3666_v26 = vld [vmem:[%s5159_s0 + $0x28] ss:$16 sps:$4 sm:$0xff]   ;;  %v2234_v56 = vsel %vm3922_vm2, %v3310_v51, %v2233_v52  ;;  %v3694_v17 = vld [vmem:[%s5159_s0 + $0xa4] ss:$8 sps:$4 sm:$0x11]  }
  0xcf   :  { %1849 = vmatmul.mubr.f32.gmra.mxu1 %v1729_v27  ;;  %3162 = vmatprep.mubr.msk.f32.mxu0 %vm345_vm3, %v1398_v38  ;;  %v3667_v27 = vld [vmem:[%s5159_s0 + $0x20] ss:$16 sps:$4 sm:$0xff]   ;;  %v3674_v38 = vld [vmem:[%s5159_s0 + $0x48] ss:$16 sps:$4 sm:$0xff]  }
  0xd0   :  { %2373 = vmatpush1.msra.mxu1 %v2291_v44  ;;  %2040 = vmatprep.subr.mxu0 %v3841_v1  ;;  %v2633_v5 = vld [vmem:[#allocation3 + $0x558] sm:$0xff]  ;;  %v3700_v32 = vld [vmem:[%s5159_s0 + $0xe0] ss:$8 sps:$4 sm:$0xee]   ;;  %v2628_v46 = vld [vmem:[#allocation3 + $0x530] sm:$0xff] }
  0xd1   :  { %1520 = vmatmul.mubr.f32.gmra.mxu0 %v1397_v39  ;;  %2374 = vmatprep.subr.mxu1 %v3841_v1  ;;  %v2226_v39 = vsel %vm3922_vm2, %v3308_v33, %v2225_v34  ;;  %v3697_v19 = vld [vmem:[%s5159_s0 + $0xb4] ss:$8 sps:$4 sm:$0x11]   ;;  %v3702_v33 = vld [vmem:[%s5159_s0 + $0xe4] ss:$8 sps:$4 sm:$0x11]  }
  0xd2   :  { %2041 = vmatpush1.msra.mxu0 %v1956_v49  ;;  %2375 = vmatpush1.msra.mxu1 %v2290_v57  ;;  %v2308_v43 = vcombine.low %v2226_v39, %v2230_v42  ;;  %v2309_v44 = vcombine.high %v2226_v39, %v2230_v42  ;;  %v2635_v49 = vld [vmem:[#allocation3 + $0x568] sm:$0xff]  ;;  %v2634_v57 = vld [vmem:[#allocation3 + $0x560] sm:$0xff]  ;;  %v3703_v34 = vld [vmem:[%s5159_s0 + $0xf0] ss:$8 sps:$4 sm:$0xee]   ;;  %v2257_v39 = vrot.slane %v3702_v33, 5 }
  0xd3   :  { %2042 = vmatprep.subr.mxu0 %v3841_v1  ;;  %3218 = vmatprep.mubr.msk.f32.mxu1 %vm345_vm3, %v1732_v53  ;;  %v3311_v53 = vrot.slane %v3679_v48, 9  ;;  %v2629_v35 = vld [vmem:[#allocation3 + $0x538] sm:$0xff] }
  0xd4   :  { %2376 = vmatprep.subr.mxu1 %v3841_v1  ;;  %1854 = vmatmul.mubr.f32.gmra.mxu1 %v1731_v54  ;;  %v3682_v54 = vld [vmem:[%s5159_s0 + $0x88] ss:$16 sps:$4 sm:$0xff]   ;;  %v3729_v33 = vld [vmem:[%s5159_s0 + $0x174] ss:$8 sps:$4 sm:$0x11]  }
  0xd5   :  { %2043 = vmatpush1.msra.mxu0 %v1955_v58  ;;  %2377 = vmatpush1.msra.mxu1 %v2289_v62  ;;  %v3683_v58 = vld [vmem:[%s5159_s0 + $0x80] ss:$16 sps:$4 sm:$0xff]   ;;  %v2238_v59 = vsel %vm3922_vm2, %v3311_v53, %v2237_v55  ;;  %v3706_v42 = vld [vmem:[%s5159_s0 + $0x108] ss:$16 sps:$4 sm:$0xff]  }
  0xd6   :  { %2044 = vmatprep.subr.mxu0 %v3841_v1  ;;  %2378 = vmatprep.subr.mxu1 %v3841_v1  ;;  %v2311_v60 = vcombine.high %v2234_v56, %v2238_v59  ;;  %v2310_v61 = vcombine.low %v2234_v56, %v2238_v59  ;;  %v3684_v62 = vld [vmem:[%s5159_s0 + $0x80] ss:$8 sps:$4 sm:$0xee]   ;;  %v3710_v55 = vld [vmem:[%s5159_s0 + $0x104] ss:$8 sps:$4 sm:$0x11]  }
  0xd7   :  { %2045 = vmatpush1.msra.mxu0 %v1954_v11  ;;  %2379 = vmatpush1.msra.mxu1 %v2288_v12  ;;  %v3312_v3 = vrot.slane %v3684_v62, 9  ;;  %v2632_v11 = vld [vmem:[#allocation3 + $0x550] sm:$0xff]  ;;  %v2627_v56 = vld [vmem:[#allocation3 + $0x528] sm:$0xff] }
  0xd8   :  { %3163 = vmatprep.mubr.msk.f32.mxu0 %vm345_vm3, %v1400_v6  ;;  %2070 = vmatprep.subr.mxu0 %v3841_v1  ;;  %v3313_v6 = vrot.slane %v3687_v0, 9  ;;  %v3691_v12 = vld [vmem:[%s5159_s0 + $0xa0] ss:$16 sps:$4 sm:$0xff]  }
  0xd9   :  { %1525 = vmatmul.mubr.f32.gmra.mxu0 %v1399_v7  ;;  %2404 = vmatprep.subr.mxu1 %v3841_v1  ;;  %v2245_v7 = vrot.slane %v3689_v2, 5  ;;  %v2242_v10 = vsel %vm3922_vm2, %v3312_v3, %v2241_v4  ;;  %v2626_v0 = vld [vmem:[#allocation3 + $0x520] sm:$0xff] }
  0xda   :  { %2071 = vmatpush2.msra.mxu0 %v1973_v15  ;;  %2405 = vmatpush2.msra.mxu1 %v2307_v16  ;;  %v3692_v16 = vld [vmem:[%s5159_s0 + $0xa0] ss:$8 sps:$4 sm:$0xee]  }
  0xdb   :  { %2072 = vmatprep.subr.mxu0 %v3841_v1  ;;  %2406 = vmatprep.subr.mxu1 %v3841_v1  ;;  %v2246_v13 = vsel %vm3922_vm2, %v3313_v6, %v2245_v7  ;;  %v3715_v3 = vld [vmem:[%s5159_s0 + $0x140] ss:$16 sps:$4 sm:$0xff]  }
  0xdc   :  { %3219 = vmatprep.mubr.msk.f32.mxu1 %vm345_vm3, %v1734_v21  ;;  %2073 = vmatpush2.msra.mxu0 %v1972_v18  ;;  %v2313_v14 = vcombine.high %v2242_v10, %v2246_v13  ;;  %v2312_v15 = vcombine.low %v2242_v10, %v2246_v13  ;;  %v3695_v18 = vld [vmem:[%s5159_s0 + $0xb0] ss:$8 sps:$4 sm:$0xee]   ;;  %v2249_v21 = vrot.slane %v3694_v17, 5 }
  0xdd   :  { %1859 = vmatmul.mubr.f32.gmra.mxu1 %v1733_v22  ;;  %2074 = vmatprep.subr.mxu0 %v3841_v1  ;;  %v3315_v22 = vrot.slane %v3695_v18, 9  ;;  %v3716_v7 = vld [vmem:[%s5159_s0 + $0x140] ss:$8 sps:$4 sm:$0xee]   ;;  %v2625_v10 = vld [vmem:[#allocation3 + $0x518] sm:$0xff] }
  0xde   :  { %2407 = vmatpush2.msra.mxu1 %v2306_v20  ;;  %2075 = vmatpush2.msra.mxu0 %v1971_v23  ;;  %v3314_v20 = vrot.slane %v3692_v16, 9  ;;  %v2253_v23 = vrot.slane %v3697_v19, 5  ;;  %v3722_v18 = vld [vmem:[%s5159_s0 + $0x168] ss:$16 sps:$4 sm:$0xff]  }
  0xdf   :  { %2408 = vmatprep.subr.mxu1 %v3841_v1  ;;  %2076 = vmatprep.subr.mxu0 %v3841_v1  ;;  %v2624_v19 = vld [vmem:[#allocation3 + $0x510] sm:$0xff] }
  0xe0   :  { %2409 = vmatpush2.msra.mxu1 %v2305_v24  ;;  %2077 = vmatpush2.msra.mxu0 %v1970_v25  ;;  %v2631_v24 = vld [vmem:[#allocation3 + $0x548] sm:$0xff] }
  0xe1   :  { %2410 = vmatprep.subr.mxu1 %v3841_v1  ;;  %3268 = vmatprep.mubr.msk.f32.mxu0 %vm345_vm3, %v3666_v26  ;;  %v3698_v25 = vld [vmem:[%s5159_s0 + $0xe8] ss:$16 sps:$4 sm:$0xff]   ;;  %v2250_v26 = vsel %vm3922_vm2, %v3314_v20, %v2249_v21 }
  0xe2   :  { %2411 = vmatpush2.msra.mxu1 %v2304_v28  ;;  %2079 = vmatmul.mubr.f32.vlgmr.msra.gmra.mxu0 %v3667_v27  ;;  %v3699_v27 = vld [vmem:[%s5159_s0 + $0xe0] ss:$16 sps:$4 sm:$0xff]   ;;  %v2254_v28 = vsel %vm3922_vm2, %v3315_v22, %v2253_v23 }
  0xe3   :  { %2682 = vmatprep.subr.mxu0 %v3841_v1  ;;  %3394 = vmatprep.subr.mxu1 %v3841_v1  ;;  %v2315_v29 = vcombine.high %v2250_v26, %v2254_v28  ;;  %v2314_v30 = vcombine.low %v2250_v26, %v2254_v28  ;;  %v3723_v22 = vld [vmem:[%s5159_s0 + $0x160] ss:$16 sps:$4 sm:$0xff]  }
  0xe4   :  { %2683 = vmatpush1.msra.mxu0 %v2637_v37  ;;  %3269 = vmatprep.mubr.msk.f32.mxu0 %vm345_vm3, %v3674_v38  ;;  %v3316_v38 = vrot.slane %v3700_v32, 9  ;;  %v3724_v28 = vld [vmem:[%s5159_s0 + $0x160] ss:$8 sps:$4 sm:$0xee]  }
  0xe5   :  { %3324 = vmatprep.mubr.msk.f32.mxu1 %vm345_vm3, %v2309_v44  ;;  %2684 = vmatprep.subr.mxu0 %v3841_v1 }
  0xe6   :  { %2413 = vmatmul.mubr.f32.vlgmr.msra.gmra.mxu1 %v2308_v43  ;;  %2685 = vmatpush1.msra.mxu0 %v2636_v45  ;;  %v2258_v48 = vsel %vm3922_vm2, %v3316_v38, %v2257_v39  ;;  %v2285_v39 = vrot.slane %v3729_v33, 5 }
  0xe7   :  { %3414 = vmatpush1.msra.mxu1 %v2637_v37  ;;  %2084 = vmatmul.mubr.f32.gmra.mxu0 %v3675_v41  ;;  %v3705_v37 = vld [vmem:[%s5159_s0 + $0xf4] ss:$8 sps:$4 sm:$0x11]   ;;  %v3317_v41 = vrot.slane %v3703_v34, 9  ;;  %v3322_v34 = vrot.slane %v3724_v28, 9 }
  0xe8   :  { %3395 = vmatprep.subr.mxu1 %v3841_v1  ;;  %2686 = vmatprep.subr.mxu0 %v3841_v1 }
  0xe9   :  { %3415 = vmatpush1.msra.mxu1 %v2636_v45  ;;  %2687 = vmatpush1.msra.mxu0 %v2635_v49  ;;  %v2261_v45 = vrot.slane %v3705_v37, 5 }
  0xea   :  { %3396 = vmatprep.subr.mxu1 %v3841_v1  ;;  %2688 = vmatprep.subr.mxu0 %v3841_v1 }
  0xeb   :  { %3416 = vmatpush1.msra.mxu1 %v2635_v49  ;;  %3270 = vmatprep.mubr.msk.f32.mxu0 %vm345_vm3, %v3682_v54  ;;  %v3707_v49 = vld [vmem:[%s5159_s0 + $0x100] ss:$16 sps:$4 sm:$0xff]   ;;  %v2262_v51 = vsel %vm3922_vm2, %v3317_v41, %v2261_v45 }
  0xec   :  { %3325 = vmatprep.mubr.msk.f32.mxu1 %vm345_vm3, %v2311_v60  ;;  %3397 = vmatprep.subr.mxu1 %v3841_v1  ;;  %v2317_v52 = vcombine.high %v2258_v48, %v2262_v51  ;;  %v2316_v53 = vcombine.low %v2258_v48, %v2262_v51  ;;  %v3708_v54 = vld [vmem:[%s5159_s0 + $0x100] ss:$8 sps:$4 sm:$0xee]   ;;  %v2265_v60 = vrot.slane %v3710_v55, 5 }
  0xed   :  { %2418 = vmatmul.mubr.f32.gmra.mxu1 %v2310_v61  ;;  %2689 = vmatpush1.msra.mxu0 %v2634_v57  ;;  %v3318_v59 = vrot.slane %v3708_v54, 9  ;;  %v3714_v61 = vld [vmem:[%s5159_s0 + $0x148] ss:$16 sps:$4 sm:$0xff]  }
  0xee   :  { %3417 = vmatpush1.msra.mxu1 %v2634_v57  ;;  %2089 = vmatmul.mubr.f32.gmra.mxu0 %v3683_v58  ;;  %v3711_v57 = vld [vmem:[%s5159_s0 + $0x110] ss:$8 sps:$4 sm:$0xee]   ;;  %v3713_v58 = vld [vmem:[%s5159_s0 + $0x114] ss:$8 sps:$4 sm:$0x11]  }
  0xef   :  { %2690 = vmatprep.subr.mxu0 %v3841_v1  ;;  %3398 = vmatprep.subr.mxu1 %v3841_v1  ;;  %v3319_v62 = vrot.slane %v3711_v57, 9  ;;  %v2269_v63 = vrot.slane %v3713_v58, 5  ;;  %v2266_v2 = vsel %vm3922_vm2, %v3318_v59, %v2265_v60  ;;  %v2622_v41 = vld [vmem:[#allocation3 + $0x500] sm:$0xff]  ;;  %v3733_v51 = vld [vmem:[%s5159_s0 + $0x30] ss:$8 sps:$4 sm:$0xcc]  }
  0xf0   :  { %2691 = vmatpush1.msra.mxu0 %v2633_v5  ;;  %3418 = vmatpush1.msra.mxu1 %v2633_v5  ;;  %v3730_v45 = vld [vmem:[%s5159_s0 + $0x20] ss:$8 sps:$4 sm:$0xcc]   ;;  %v3365_v59 = vrot.slane %v3733_v51, 10  ;;  %v2563_v60 = vrot.slane %v3735_v40, 6 }
  0xf1   :  { %2692 = vmatprep.subr.mxu0 %v3841_v1  ;;  %3399 = vmatprep.subr.mxu1 %v3841_v1  ;;  %v2270_v4 = vsel %vm3922_vm2, %v3319_v62, %v2269_v63  ;;  %v3364_v55 = vrot.slane %v3730_v45, 10  ;;  %v2639_v57 = vld [vmem:[#allocation3 + $0x588] sm:$0xff]  ;;  %v2638_v63 = vld [vmem:[#allocation3 + $0x580] sm:$0xff] }
  0xf2   :  { %3326 = vmatprep.mubr.msk.f32.mxu1 %vm345_vm3, %v2313_v14  ;;  %3271 = vmatprep.mubr.msk.f32.mxu0 %vm345_vm3, %v3690_v9  ;;  %v2319_v5 = vcombine.high %v2266_v2, %v2270_v4  ;;  %v2318_v6 = vcombine.low %v2266_v2, %v2270_v4  ;;  %v3718_v9 = vld [vmem:[%s5159_s0 + $0x144] ss:$8 sps:$4 sm:$0x11]   ;;  %v3320_v14 = vrot.slane %v3716_v7, 9 }
  0xf3   :  { %2423 = vmatmul.mubr.f32.gmra.mxu1 %v2312_v15  ;;  %2693 = vmatpush1.msra.mxu0 %v2632_v11  ;;  %v2273_v15 = vrot.slane %v3718_v9, 5  ;;  %v3738_v2 = vld [vmem:[%s5159_s0 + $0xe4] ss:$8 sps:$4 sm:$0x33]  }
  0xf4   :  { %3419 = vmatpush1.msra.mxu1 %v2632_v11  ;;  %2094 = vmatmul.mubr.f32.gmra.mxu0 %v3691_v12  ;;  %v3719_v11 = vld [vmem:[%s5159_s0 + $0x150] ss:$8 sps:$4 sm:$0xee]   ;;  %v3721_v12 = vld [vmem:[%s5159_s0 + $0x154] ss:$8 sps:$4 sm:$0x11]  }
  0xf5   :  { %2694 = vmatprep.subr.mxu0 %v3841_v1  ;;  %3400 = vmatprep.subr.mxu1 %v3841_v1  ;;  %v3321_v16 = vrot.slane %v3719_v11, 9  ;;  %v2277_v17 = vrot.slane %v3721_v12, 5  ;;  %v2274_v21 = vsel %vm3922_vm2, %v3320_v14, %v2273_v15  ;;  %v2591_v11 = vrot.slane %v3738_v2, 6 }
  0xf6   :  { %2695 = vmatpush1.msra.mxu0 %v2631_v24  ;;  %3420 = vmatpush1.msra.mxu1 %v2631_v24 }
  0xf7   :  { %2696 = vmatprep.subr.mxu0 %v3841_v1  ;;  %3401 = vmatprep.subr.mxu1 %v3841_v1  ;;  %v2278_v24 = vsel %vm3922_vm2, %v3321_v16, %v2277_v17  ;;  %v3742_v16 = vld [vmem:[%s5159_s0 + $0x40] ss:$8 sps:$4 sm:$0xcc]  }
  0xf8   :  { %3327 = vmatprep.mubr.msk.f32.mxu1 %vm345_vm3, %v2315_v29  ;;  %3272 = vmatprep.mubr.msk.f32.mxu0 %vm345_vm3, %v3698_v25  ;;  %v2321_v26 = vcombine.high %v2274_v21, %v2278_v24 }
  0xf9   :  { %2428 = vmatmul.mubr.f32.gmra.mxu1 %v2314_v30  ;;  %2697 = vmatpush1.msra.mxu0 %v2630_v31  ;;  %v3726_v30 = vld [vmem:[%s5159_s0 + $0x164] ss:$8 sps:$4 sm:$0x11]  }
  0xfa   :  { %v428_v36 = vpop.f32.mrf.mxu0  ;;  %3421 = vmatpush1.msra.mxu1 %v2630_v31  ;;  %2099 = vmatmul.mubr.f32.gmra.mxu0 %v3699_v27  ;;  %v2320_v27 = vcombine.low %v2274_v21, %v2278_v24  ;;  %v3727_v31 = vld [vmem:[%s5159_s0 + $0x170] ss:$8 sps:$4 sm:$0xee]  }
  0xfb   :  { %2698 = vmatprep.subr.mxu0 %v3841_v1  ;;  %3402 = vmatprep.subr.mxu1 %v3841_v1  ;;  %v3323_v37 = vrot.slane %v3727_v31, 9 }
  0xfc   :  { %v573_v43 = vpop.f32.mrf.mxu1  ;;  %v430_v44 = vpop.f32.mrf.mxu0  ;;  %2699 = vmatpush1.msra.mxu0 %v2629_v35  ;;  %3422 = vmatpush1.msra.mxu1 %v2629_v35  ;;  %v2623_v35 = vld [vmem:[#allocation3 + $0x508] sm:$0xff] }
  0xfd   :  { %v4846_v47 = vadd.f32 %v573_v43, %v428_v36  ;;  %2700 = vmatprep.subr.mxu0 %v3841_v1  ;;  %3403 = vmatprep.subr.mxu1 %v3841_v1  ;;  %v2281_v36 = vrot.slane %v3726_v30, 5  ;;  %v2641_v44 = vld [vmem:[#allocation3 + $0x598] sm:$0xff]  ;;  %v2286_v48 = vsel %vm3922_vm2, %v3323_v37, %v2285_v39 }
  0xfe   :  { %v575_v50 = vpop.f32.mrf.mxu1  ;;  %3273 = vmatprep.mubr.msk.f32.mxu0 %vm345_vm3, %v3706_v42  ;;  %2701 = vmatpush1.msra.mxu0 %v2628_v46 }
  0xff   :  { %3328 = vmatprep.mubr.msk.f32.mxu1 %vm345_vm3, %v2317_v52  ;;  %3423 = vmatpush1.msra.mxu1 %v2628_v46  ;;  %v2282_v43 = vsel %vm3922_vm2, %v3322_v34, %v2281_v36  ;;  %v3732_v50 = vld [vmem:[%s5159_s0 + $0x24] ss:$8 sps:$4 sm:$0x33]  }
 0x100   :  { %2433 = vmatmul.mubr.f32.gmra.mxu1 %v2316_v53  ;;  %2104 = vmatmul.mubr.f32.gmra.mxu0 %v3707_v49  ;;  %v2640_v49 = vld [vmem:[#allocation3 + $0x590] sm:$0xff]  ;;  %v2323_v53 = vcombine.high %v2282_v43, %v2286_v48  ;;  %v2322_v54 = vcombine.low %v2282_v43, %v2286_v48  ;;  %v2559_v58 = vrot.slane %v3732_v50, 6  ;;  %v3750_v34 = vld [vmem:[%s5159_s0 + $0x104] ss:$8 sps:$4 sm:$0x33]  }
 0x101   :  { %2702 = vmatprep.subr.mxu0 %v3841_v1  ;;  %3404 = vmatprep.subr.mxu1 %v3841_v1  ;;  %v2599_v43 = vrot.slane %v3750_v34, 6  ;;  %v3772_v34 = vld [vmem:[%s5159_s0 + $0x160] ss:$8 sps:$4 sm:$0xcc]  }
 0x102   :  { %2703 = vmatpush1.msra.mxu0 %v2627_v56  ;;  %3424 = vmatpush1.msra.mxu1 %v2627_v56 }
 0x103   :  { %2704 = vmatprep.subr.mxu0 %v3841_v1  ;;  %3405 = vmatprep.subr.mxu1 %v3841_v1 }
 0x104   :  { %3274 = vmatprep.mubr.msk.f32.mxu0 %vm345_vm3, %v3714_v61  ;;  %2705 = vmatpush1.msra.mxu0 %v2626_v0  ;;  %v3736_v61 = vld [vmem:[%s5159_s0 + $0xe0] ss:$8 sps:$4 sm:$0xcc]  }
 0x105   :  { %3329 = vmatprep.mubr.msk.f32.mxu1 %vm345_vm3, %v2319_v5  ;;  %3425 = vmatpush1.msra.mxu1 %v2626_v0  ;;  %v2560_v0 = vsel %vm4165_vm6, %v3364_v55, %v2559_v58  ;;  %v2564_v5 = vsel %vm4165_vm6, %v3365_v59, %v2563_v60  ;;  %v3372_v7 = vrot.slane %v3736_v61, 10  ;;  %v3759_v55 = vld [vmem:[%s5159_s0 + $0x94] ss:$8 sps:$4 sm:$0x33]  }
 0x106   :  { %2438 = vmatmul.mubr.f32.gmra.mxu1 %v2318_v6  ;;  %2109 = vmatmul.mubr.f32.gmra.mxu0 %v3715_v3  ;;  %v3739_v3 = vld [vmem:[%s5159_s0 + $0xf0] ss:$8 sps:$4 sm:$0xcc]   ;;  %v3741_v6 = vld [vmem:[%s5159_s0 + $0xf4] ss:$8 sps:$4 sm:$0x33]   ;;  %v2642_v14 = vcombine.low %v2560_v0, %v2564_v5 }
 0x107   :  { %v433_v13 = vpop.f32.mrf.mxu0  ;;  %2706 = vmatprep.subr.mxu0 %v3841_v1  ;;  %3406 = vmatprep.subr.mxu1 %v3841_v1  ;;  %v3373_v12 = vrot.slane %v3739_v3, 10  ;;  %v2595_v15 = vrot.slane %v3741_v6, 6 }
 0x108   :  { %2707 = vmatpush1.msra.mxu0 %v2625_v10  ;;  %3426 = vmatpush1.msra.mxu1 %v2625_v10  ;;  %v2643_v10 = vcombine.high %v2560_v0, %v2564_v5  ;;  %v3760_v0 = vld [vmem:[%s5159_s0 + $0x140] ss:$8 sps:$4 sm:$0xcc]   ;;  %v3763_v5 = vld [vmem:[%s5159_s0 + $0x150] ss:$8 sps:$4 sm:$0xcc]  }
 0x109   :  { %v435_v20 = vpop.f32.mrf.mxu0  ;;  %2708 = vmatprep.subr.mxu0 %v3841_v1  ;;  %3407 = vmatprep.subr.mxu1 %v3841_v1  ;;  %v2596_v21 = vsel %vm4165_vm6, %v3373_v12, %v2595_v15 }
 0x10a   :  { %v578_v23 = vpop.f32.mrf.mxu1  ;;  %3275 = vmatprep.mubr.msk.f32.mxu0 %vm345_vm3, %v3722_v18  ;;  %2709 = vmatpush1.msra.mxu0 %v2624_v19  ;;  %v2592_v18 = vsel %vm4165_vm6, %v3372_v7, %v2591_v11  ;;  %v3745_v20 = vld [vmem:[%s5159_s0 + $0x50] ss:$8 sps:$4 sm:$0xcc]   ;;  %v3765_v7 = vld [vmem:[%s5159_s0 + $0x154] ss:$8 sps:$4 sm:$0x33]  }
 0x10b   :  { %v4913_v25 = vadd.f32 %v578_v23, %v433_v13  ;;  %3330 = vmatprep.mubr.msk.f32.mxu1 %vm345_vm3, %v2321_v26  ;;  %3427 = vmatpush1.msra.mxu1 %v2624_v19  ;;  %v3744_v19 = vld [vmem:[%s5159_s0 + $0x44] ss:$8 sps:$4 sm:$0x33]   ;;  %v3366_v23 = vrot.slane %v3742_v16, 10  ;;  %v2650_v26 = vcombine.low %v2592_v18, %v2596_v21 }
 0x10c   :  { %v580_v29 = vpop.f32.mrf.mxu1  ;;  %2443 = vmatmul.mubr.f32.gmra.mxu1 %v2320_v27  ;;  %2114 = vmatmul.mubr.f32.gmra.mxu0 %v3723_v22  ;;  %v3747_v22 = vld [vmem:[%s5159_s0 + $0x54] ss:$8 sps:$4 sm:$0x33]   ;;  %v2651_v27 = vcombine.high %v2592_v18, %v2596_v21  ;;  %v2567_v28 = vrot.slane %v3744_v19, 6 }
 0x10d   :  { %v438_v32 = vpop.f32.mrf.mxu0  ;;  %2710 = vmatprep.subr.mxu0 %v3841_v1  ;;  %3408 = vmatprep.subr.mxu1 %v3841_v1  ;;  %v3367_v29 = vrot.slane %v3745_v20, 10  ;;  %v2571_v31 = vrot.slane %v3747_v22, 6  ;;  %v3766_v18 = vld [vmem:[%s5159_s0 + $0xa0] ss:$8 sps:$4 sm:$0xcc]  }
 0x10e   :  { %2711 = vmatpush1.msra.mxu0 %v2623_v35  ;;  %3428 = vmatpush1.msra.mxu1 %v2623_v35  ;;  %v3751_v35 = vld [vmem:[%s5159_s0 + $0x110] ss:$8 sps:$4 sm:$0xcc]   ;;  %v3768_v21 = vld [vmem:[%s5159_s0 + $0xa4] ss:$8 sps:$4 sm:$0x33]  }
 0x10f   :  { %v440_v38 = vpop.f32.mrf.mxu0  ;;  %2712 = vmatprep.subr.mxu0 %v3841_v1  ;;  %3409 = vmatprep.subr.mxu1 %v3841_v1  ;;  %v2572_v37 = vsel %vm4165_vm6, %v3367_v29, %v2571_v31  ;;  %v3769_v22 = vld [vmem:[%s5159_s0 + $0xb0] ss:$8 sps:$4 sm:$0xcc]   ;;  %v2583_v31 = vrot.slane %v3768_v21, 6 }
 0x110   :  { %v583_v42 = vpop.f32.mrf.mxu1  ;;  %2713 = vmatpush1.msra.mxu0 %v2622_v41  ;;  %3429 = vmatpush1.msra.mxu1 %v2622_v41  ;;  %v3753_v38 = vld [vmem:[%s5159_s0 + $0x114] ss:$8 sps:$4 sm:$0x33]  }
 0x111   :  { %v4938_v46 = vadd.f32 %v583_v42, %v438_v32  ;;  %2738 = vmatprep.subr.mxu0 %v3841_v1  ;;  %3410 = vmatprep.subr.mxu1 %v3841_v1  ;;  %v3748_v32 = vld [vmem:[%s5159_s0 + $0x100] ss:$8 sps:$4 sm:$0xcc]   ;;  %v2603_v48 = vrot.slane %v3753_v38, 6 }
 0x112   :  { %v585_v52 = vpop.f32.mrf.mxu1  ;;  %3331 = vmatprep.mubr.msk.f32.mxu1 %vm345_vm3, %v2323_v53  ;;  %2739 = vmatpush2.msra.mxu0 %v2641_v44  ;;  %v3374_v39 = vrot.slane %v3748_v32, 10  ;;  %v3757_v53 = vld [vmem:[%s5159_s0 + $0x90] ss:$8 sps:$4 sm:$0xcc]   ;;  %v3371_v32 = vrot.slane %v3769_v22, 10 }
 0x113   :  { %v443_v56 = vpop.f32.mrf.mxu0  ;;  %2448 = vmatmul.mubr.f32.gmra.mxu1 %v2322_v54  ;;  %2740 = vmatprep.subr.mxu0 %v3841_v1  ;;  %v3756_v52 = vld [vmem:[%s5159_s0 + $0x84] ss:$8 sps:$4 sm:$0x33]   ;;  %v3369_v61 = vrot.slane %v3757_v53, 10 }
 0x114   :  { %3430 = vmatpush2.msra.mxu1 %v2641_v44  ;;  %2741 = vmatpush2.msra.mxu0 %v2640_v49  ;;  %v3375_v44 = vrot.slane %v3751_v35, 10  ;;  %v2600_v51 = vsel %vm4165_vm6, %v3374_v39, %v2599_v43  ;;  %v2575_v60 = vrot.slane %v3756_v52, 6  ;;  %v3775_v38 = vld [vmem:[%s5159_s0 + $0x170] ss:$8 sps:$4 sm:$0xcc]   ;;  %v3378_v43 = vrot.slane %v3772_v34, 10 }
 0x115   :  { %v445_v62 = vpop.f32.mrf.mxu0  ;;  %3411 = vmatprep.subr.mxu1 %v3841_v1  ;;  %2742 = vmatprep.subr.mxu0 %v3841_v1 }
 0x116   :  { %v588_v4 = vpop.f32.mrf.mxu1  ;;  %3431 = vmatpush2.msra.mxu1 %v2640_v49  ;;  %2743 = vmatpush2.msra.mxu0 %v2639_v57  ;;  %v3754_v49 = vld [vmem:[%s5159_s0 + $0x80] ss:$8 sps:$4 sm:$0xcc]   ;;  %v2604_v40 = vsel %vm4165_vm6, %v3375_v44, %v2603_v48 }
 0x117   :  { %v4973_v9 = vadd.f32 %v588_v4, %v443_v56  ;;  %3412 = vmatprep.subr.mxu1 %v3841_v1  ;;  %2744 = vmatprep.subr.mxu0 %v3841_v1  ;;  %v3368_v56 = vrot.slane %v3754_v49, 10  ;;  %v2653_v58 = vcombine.high %v2600_v51, %v2604_v40  ;;  %v2652_v59 = vcombine.low %v2600_v51, %v2604_v40  ;;  %v3762_v4 = vld [vmem:[%s5159_s0 + $0x144] ss:$8 sps:$4 sm:$0x33]  }
 0x118   :  { %v590_v13 = vpop.f32.mrf.mxu1  ;;  %3432 = vmatpush2.msra.mxu1 %v2639_v57  ;;  %2745 = vmatpush2.msra.mxu0 %v2638_v63  ;;  %v3379_v49 = vrot.slane %v3775_v38, 10 }
 0x119   :  { %v448_v17 = vpop.f32.mrf.mxu0  ;;  %3413 = vmatprep.subr.mxu1 %v3841_v1  ;;  %3380 = vmatprep.mubr.msk.f32.mxu0 %vm345_vm3, %v2643_v10  ;;  %v2568_v1 = vsel %vm4165_vm6, %v3366_v23, %v2567_v28  ;;  %v2576_v3 = vsel %vm4165_vm6, %v3368_v56, %v2575_v60  ;;  %v3376_v10 = vrot.slane %v3760_v0, 10  ;;  %v2607_v13 = vrot.slane %v3762_v4, 6 }
 0x11a   :  { %3433 = vmatpush2.msra.mxu1 %v2638_v63  ;;  %2747 = vmatmul.mubr.f32.vlgmr.msra.gmra.mxu0 %v2642_v14  ;;  %v2645_v42 = vcombine.high %v2568_v1, %v2572_v37  ;;  %v2644_v45 = vcombine.low %v2568_v1, %v2572_v37  ;;  %v2579_v63 = vrot.slane %v3759_v55, 6  ;;  %v3377_v14 = vrot.slane %v3763_v5, 10  ;;  %v3774_v37 = vld [vmem:[%s5159_s0 + $0x164] ss:$8 sps:$4 sm:$0x33]  }
 0x11b   :  { %v450_v24 = vpop.f32.mrf.mxu0  ;;  %3384 = vmatprep.mubr.msk.f32.mxu1 %vm345_vm3, %v2651_v27  ;;  %v2608_v20 = vsel %vm4165_vm6, %v3376_v10, %v2607_v13  ;;  %v3370_v27 = vrot.slane %v3766_v18, 10  ;;  %v2615_v48 = vrot.slane %v3774_v37, 6 }
 0x11c   :  { %v593_v30 = vpop.f32.mrf.mxu1  ;;  %2767 = vmatmul.mubr.f32.vlgmr.msra.gmra.mxu1 %v2650_v26  ;;  %3381 = vmatprep.mubr.msk.f32.mxu0 %vm345_vm3, %v2645_v42  ;;  %v2580_v6 = vsel %vm4165_vm6, %v3369_v61, %v2579_v63  ;;  %v3771_v26 = vld [vmem:[%s5159_s0 + $0xb4] ss:$8 sps:$4 sm:$0x33]  }
 0x11d   :  { %v5000_v33 = vadd.f32 %v593_v30, %v448_v17  ;;  %3385 = vmatprep.mubr.msk.f32.mxu1 %vm345_vm3, %v2653_v58  ;;  %v2647_v12 = vcombine.high %v2576_v3, %v2580_v6  ;;  %v2646_v15 = vcombine.low %v2576_v3, %v2580_v6  ;;  %v2611_v17 = vrot.slane %v3765_v7, 6  ;;  %v3777_v42 = vld [vmem:[%s5159_s0 + $0x174] ss:$8 sps:$4 sm:$0x33]  }
 0x11e   :  { %v595_v36 = vpop.f32.mrf.mxu1  ;;  %2752 = vmatmul.mubr.f32.gmra.mxu0 %v2644_v45  ;;  %v2587_v1 = vrot.slane %v3771_v26, 6  ;;  %v2619_v52 = vrot.slane %v3777_v42, 6  ;;  %v2616_v53 = vsel %vm4165_vm6, %v3378_v43, %v2615_v48 }
 0x11f   :  { %v453_v41 = vpop.f32.mrf.mxu0  ;;  %3382 = vmatprep.mubr.msk.f32.mxu0 %vm345_vm3, %v2647_v12  ;;  %v2612_v24 = vsel %vm4165_vm6, %v3377_v14, %v2611_v17  ;;  %v2584_v36 = vsel %vm4165_vm6, %v3370_v27, %v2583_v31 }
 0x120   :  { %2772 = vmatmul.mubr.f32.gmra.mxu1 %v2652_v59  ;;  %v2655_v29 = vcombine.high %v2608_v20, %v2612_v24  ;;  %v2654_v30 = vcombine.low %v2608_v20, %v2612_v24  ;;  %v2620_v40 = vsel %vm4165_vm6, %v3379_v49, %v2619_v52 }
 0x121   :  { %v455_v50 = vpop.f32.mrf.mxu0  ;;  %v2657_v56 = vcombine.high %v2616_v53, %v2620_v40  ;;  %v2656_v58 = vcombine.low %v2616_v53, %v2620_v40 }
 0x122   :  { %v598_v54 = vpop.f32.mrf.mxu1  ;;  %2757 = vmatmul.mubr.f32.gmra.mxu0 %v2646_v15  ;;  %3386 = vmatprep.mubr.msk.f32.mxu1 %vm345_vm3, %v2655_v29 }
 0x123   :  { %v5033_v57 = vadd.f32 %v598_v54, %v453_v41  ;;  %v2588_v41 = vsel %vm4165_vm6, %v3371_v32, %v2587_v1 }
 0x124   :  { %v600_v62 = vpop.f32.mrf.mxu1  ;;  %2777 = vmatmul.mubr.f32.gmra.mxu1 %v2654_v30  ;;  %v2649_v45 = vcombine.high %v2584_v36, %v2588_v41  ;;  %v2648_v50 = vcombine.low %v2584_v36, %v2588_v41 }
 0x125   :  { %v458_v2 = vpop.f32.mrf.mxu0  ;;  %3387 = vmatprep.mubr.msk.f32.mxu1 %vm345_vm3, %v2657_v56 }
 0x126   :  { %3383 = vmatprep.mubr.msk.f32.mxu0 %vm345_vm3, %v2649_v45  ;;  %vm2955_vm3 = vcmask 27648  }
 0x127   :  { %v460_v11 = vpop.f32.mrf.mxu0  ;;  %2762 = vmatmul.mubr.f32.gmra.mxu0 %v2648_v50 }
 0x128   :  { %v603_v16 = vpop.f32.mrf.mxu1  ;;  %2782 = vmatmul.mubr.f32.gmra.mxu1 %v2656_v58 }
 0x129   :  { %v5055_v19 = vadd.f32 %v603_v16, %v458_v2 }
 0x12a   :  { %v605_v23 = vpop.f32.mrf.mxu1 }
 0x12b   :  { %v463_v28 = vpop.f32.mrf.mxu0 }
 0x12d   :  { %v465_v35 = vpop.f32.mrf.mxu0 }
 0x12e   :  { %v608_v39 = vpop.f32.mrf.mxu1 }
 0x12f   :  { %v609_v44 = vadd.f32 %v608_v39, %v463_v28 }
 0x130   :  { %v610_v51 = vpop.f32.mrf.mxu1 }
 0x132   :  { %v902_v54 = vpop.f32.mrf.mxu0 }
 0x133   :  { %v941_v55 = vadd.f32 %v902_v54, %v4846_v47 }
 0x134   :  { %v904_v59 = vpop.f32.mrf.mxu0  ;;  %v1157_v60 = vpop.f32.mrf.mxu1 }
 0x135   :  { %v1196_v61 = vadd.f32 %v1157_v60, %v941_v55 }
 0x136   :  { %v1159_v62 = vpop.f32.mrf.mxu1 }
 0x138   :  { %v907_v63 = vpop.f32.mrf.mxu0 }
 0x139   :  { %v942_v0 = vadd.f32 %v907_v63, %v4913_v25 }
 0x13a   :  { %v909_v2 = vpop.f32.mrf.mxu0 }
 0x13c   :  { %v1162_v3 = vpop.f32.mrf.mxu1 }
 0x13d   :  { %v1197_v4 = vadd.f32 %v1162_v3, %v942_v0 }
 0x13e   :  { %v912_v8 = vpop.f32.mrf.mxu0  ;;  %v1164_v5 = vpop.f32.mrf.mxu1 }
 0x13f   :  { %v943_v6 = vadd.f32 %v912_v8, %v4938_v46 }
 0x140   :  { %v914_v47 = vpop.f32.mrf.mxu0 }
 0x142   :  { %v1167_v7 = vpop.f32.mrf.mxu1 }
 0x143   :  { %v1198_v10 = vadd.f32 %v1167_v7, %v943_v6 }
 0x144   :  { %v917_v11 = vpop.f32.mrf.mxu0  ;;  %v1169_v12 = vpop.f32.mrf.mxu1 }
 0x145   :  { %v944_v13 = vadd.f32 %v917_v11, %v4973_v9 }
 0x146   :  { %v919_v14 = vpop.f32.mrf.mxu0 }
 0x148   :  { %v1172_v15 = vpop.f32.mrf.mxu1 }
 0x149   :  { %v1199_v16 = vadd.f32 %v1172_v15, %v944_v13 }
 0x14a   :  { %v922_v17 = vpop.f32.mrf.mxu0  ;;  %v1174_v18 = vpop.f32.mrf.mxu1 }
 0x14b   :  { %v945_v25 = vadd.f32 %v922_v17, %v5000_v33 }
 0x14c   :  { %v924_v20 = vpop.f32.mrf.mxu0 }
 0x14e   :  { %v1177_v21 = vpop.f32.mrf.mxu1 }
 0x14f   :  { %v1200_v22 = vadd.f32 %v1177_v21, %v945_v25 }
 0x150   :  { %v927_v23 = vpop.f32.mrf.mxu0  ;;  %v1179_v24 = vpop.f32.mrf.mxu1 }
 0x151   :  { %v946_v46 = vadd.f32 %v927_v23, %v5033_v57 }
 0x152   :  { %v929_v26 = vpop.f32.mrf.mxu0 }
 0x154   :  { %v1182_v27 = vpop.f32.mrf.mxu1 }
 0x155   :  { %v1201_v28 = vadd.f32 %v1182_v27, %v946_v46 }
 0x156   :  { %v932_v29 = vpop.f32.mrf.mxu0  ;;  %v1184_v30 = vpop.f32.mrf.mxu1 }
 0x157   :  { %v947_v9 = vadd.f32 %v932_v29, %v5055_v19 }
 0x158   :  { %v934_v31 = vpop.f32.mrf.mxu0 }
 0x15a   :  { %v1187_v32 = vpop.f32.mrf.mxu1 }
 0x15b   :  { %v1202_v1 = vadd.f32 %v1187_v32, %v947_v9 }
 0x15c   :  { %v937_v34 = vpop.f32.mrf.mxu0  ;;  %v1189_v35 = vpop.f32.mrf.mxu1 }
 0x15d   :  { %v948_v33 = vadd.f32 %v937_v34, %v609_v44 }
 0x15e   :  { %v939_v36 = vpop.f32.mrf.mxu0 }
 0x160   :  { %v1192_v37 = vpop.f32.mrf.mxu1 }
 0x161   :  { %v1203_v38 = vadd.f32 %v1192_v37, %v948_v33 }
 0x162   :  { %v1194_v39 = vpop.f32.mrf.mxu1 }
 0x16a   :  { %v1491_v41 = vpop.f32.mrf.mxu0 }
 0x16b   :  { %v1530_v42 = vadd.f32 %v1491_v41, %v1196_v61 }
 0x16c   :  { %v1493_v57 = vpop.f32.mrf.mxu0  ;;  %v1825_v43 = vpop.f32.mrf.mxu1 }
 0x16d   :  { %v5101_v45 = vadd.f32 %v1825_v43, %v1530_v42 }
 0x16e   :  { %v1827_v48 = vpop.f32.mrf.mxu1 }
 0x170   :  { %v1496_v49 = vpop.f32.mrf.mxu0 }
 0x171   :  { %v1531_v50 = vadd.f32 %v1496_v49, %v1197_v4 }
 0x172   :  { %v1498_v19 = vpop.f32.mrf.mxu0 }
 0x174   :  { %v1830_v51 = vpop.f32.mrf.mxu1 }
 0x175   :  { %v5103_v52 = vadd.f32 %v1830_v51, %v1531_v50 }
 0x176   :  { %v1501_v53 = vpop.f32.mrf.mxu0  ;;  %v1832_v54 = vpop.f32.mrf.mxu1 }
 0x177   :  { %v1532_v44 = vadd.f32 %v1501_v53, %v1198_v10 }
 0x178   :  { %v1503_v40 = vpop.f32.mrf.mxu0 }
 0x17a   :  { %v1835_v55 = vpop.f32.mrf.mxu1 }
 0x17b   :  { %v5105_v56 = vadd.f32 %v1835_v55, %v1532_v44 }
 0x17c   :  { %v1506_v58 = vpop.f32.mrf.mxu0  ;;  %v1837_v59 = vpop.f32.mrf.mxu1 }
 0x17d   :  { %v1533_v60 = vadd.f32 %v1506_v58, %v1199_v16 }
 0x17e   :  { %v1508_v61 = vpop.f32.mrf.mxu0 }
 0x180   :  { %v1840_v62 = vpop.f32.mrf.mxu1 }
 0x181   :  { %v5107_v63 = vadd.f32 %v1840_v62, %v1533_v60 }
 0x182   :  { %v1511_v0 = vpop.f32.mrf.mxu0  ;;  %v1842_v2 = vpop.f32.mrf.mxu1 }
 0x183   :  { %v1534_v3 = vadd.f32 %v1511_v0, %v1200_v22 }
 0x184   :  { %v1513_v4 = vpop.f32.mrf.mxu0 }
 0x186   :  { %v1845_v8 = vpop.f32.mrf.mxu1 }
 0x187   :  { %v1868_v5 = vadd.f32 %v1845_v8, %v1534_v3  ;;  %v5126_v3 = vld [vmem:[%s5161_s2] ss:$0 sm:$0xff] }
 0x188   :  { %v1847_v6 = vpop.f32.mrf.mxu1 }
 0x18a   :  { %v1516_v47 = vpop.f32.mrf.mxu0 }
 0x18b   :  { %v1535_v7 = vadd.f32 %v1516_v47, %v1201_v28 }
 0x18c   :  { %v1518_v10 = vpop.f32.mrf.mxu0 }
 0x18f   :  { %v1850_v11 = vpop.f32.mrf.mxu1 }
 0x190   :  { %v1869_v12 = vadd.f32 %v1850_v11, %v1535_v7 }
 0x191   :  { %v1852_v13 = vpop.f32.mrf.mxu1  ;;  %v1521_v14 = vpop.f32.mrf.mxu0 }
 0x192   :  { %v1536_v15 = vadd.f32 %v1521_v14, %v1202_v1 }
 0x193   :  { %v1523_v16 = vpop.f32.mrf.mxu0 }
 0x194   :  { %v1855_v17 = vpop.f32.mrf.mxu1 }
 0x195   :  { %v5109_v18 = vadd.f32 %v1855_v17, %v1536_v15 }
 0x196   :  { %v1857_v25 = vpop.f32.mrf.mxu1 }
 0x199   :  { %v1526_v20 = vpop.f32.mrf.mxu0 }
 0x19a   :  { %v1537_v21 = vadd.f32 %v1526_v20, %v1203_v38 }
 0x19b   :  { %v1528_v22 = vpop.f32.mrf.mxu0 }
 0x19d   :  { %v1860_v23 = vpop.f32.mrf.mxu1 }
 0x19e   :  { %v5111_v24 = vadd.f32 %v1860_v23, %v1537_v21 }
 0x19f   :  { %v1862_v46 = vpop.f32.mrf.mxu1 }
 0x1a2   :  { %v2080_v26 = vpop.f32.mrf.mxu0 }
 0x1a3   :  { %v2119_v59 = vadd.f32 %v2080_v26, %v5101_v45 }
 0x1a4   :  { %v2082_v27 = vpop.f32.mrf.mxu0 }
 0x1a6   :  { %v2414_v28 = vpop.f32.mrf.mxu1 }
 0x1a7   :  { %v2085_v29 = vpop.f32.mrf.mxu0  ;;  %v2453_v62 = vadd.f32 %v2414_v28, %v2119_v59 }
 0x1a8   :  { %v2416_v30 = vpop.f32.mrf.mxu1  ;;  %v2120_v0 = vadd.f32 %v2085_v29, %v5103_v52  ;;  %v5133_v52 = vld [vmem:[%s5162_s3] sm:$0xff] }
 0x1a9   :  { %v2087_v9 = vpop.f32.mrf.mxu0 }
 0x1ad   :  { %v2419_v31 = vpop.f32.mrf.mxu1 }
 0x1ae   :  { %v2090_v32 = vpop.f32.mrf.mxu0  ;;  %v2454_v11 = vadd.f32 %v2419_v31, %v2120_v0 }
 0x1af   :  { %v2421_v1 = vpop.f32.mrf.mxu1  ;;  %v2121_v22 = vadd.f32 %v2090_v32, %v5105_v56  ;;  %v2835_v32 = vld [vmem:[%s5162_s3 + $0x8] sm:$0xff]  ;;  %s3843_s3 = smov [#allocation6]  }
 0x1b0   :  { %v2092_v34 = vpop.f32.mrf.mxu0  ;;  %s2971_s25 = sshll.u32 %s3843_s3, 4  ;;  %s2972_s25 = int_to_ptr.vmem [resolvable:$true] %s2971_s25 }
 0x1b1   :  { %s3814_s26 = scalar_lea.vmem %s2972_s25, 16  ;;  %s3818_s1 = scalar_lea.vmem %s2972_s25, 32 }
 0x1b2   :  { %p3815_p5 = scmp.ne.s32.totalorder %s2972_s25, %s3814_s26  ;;  %p3819_p6 = scmp.lt.s32.totalorder %s2972_s25, %s2972_s25 }
 0x1b3   :  { %v2424_v35 = vpop.f32.mrf.mxu1  ;;  %p3820_p7 = scmp.lt.s32.totalorder %s3818_s1, %s3814_s26 }
 0x1b4   :  { %v5113_v33 = vpop.f32.mrf.mxu0  ;;  %v2455_v30 = vadd.f32 %v2424_v35, %v2121_v22 }
 0x1b5   :  { %v2426_v36 = vpop.f32.mrf.mxu1  ;;  %p3821_p8 = por %p3820_p7, %p3819_p6 }
 0x1b6   :  { %v2097_v37 = vpop.f32.mrf.mxu0 }
 0x1b7   :  { %p3822_p9 = pnand %p3821_p8, %p3815_p5 }
 0x1b9   :  { %v5115_v38 = vpop.f32.mrf.mxu1 }
 0x1ba   :  { %v2100_v39 = vpop.f32.mrf.mxu0 }
 0x1bb   :  { %v2431_v41 = vpop.f32.mrf.mxu1  ;;  %v2123_v61 = vadd.f32 %v2100_v39, %v1868_v5  ;;  %v2122_v39 = vadd.f32 %v5113_v33, %v5107_v63 }
 0x1bc   :  { %v2102_v42 = vpop.f32.mrf.mxu0 }
 0x1c0   :  { %v2434_v57 = vpop.f32.mrf.mxu1  ;;  %v2105_v43 = vpop.f32.mrf.mxu0 }
 0x1c1   :  { %v2457_v4 = vadd.f32 %v2434_v57, %v2123_v61  ;;  %v2124_v13 = vadd.f32 %v2105_v43, %v1869_v12 }
 0x1c2   :  { %v2436_v48 = vpop.f32.mrf.mxu1  ;;  %v2107_v49 = vpop.f32.mrf.mxu0 }
 0x1c6   :  { %v2439_v50 = vpop.f32.mrf.mxu1  ;;  %v2110_v19 = vpop.f32.mrf.mxu0 }
 0x1c7   :  { %v2458_v12 = vadd.f32 %v2439_v50, %v2124_v13  ;;  %v2125_v9 = vadd.f32 %v2110_v19, %v5109_v18  ;;  %v2456_v19 = vadd.f32 %v5115_v38, %v2122_v39 }
 0x1c8   :  { %v2441_v51 = vpop.f32.mrf.mxu1  ;;  %v2112_v53 = vpop.f32.mrf.mxu0 }
 0x1cc   :  { %v2444_v54 = vpop.f32.mrf.mxu1  ;;  %v5117_v44 = vpop.f32.mrf.mxu0 }
 0x1cd   :  { %v2459_v41 = vadd.f32 %v2444_v54, %v2125_v9  ;;  %v2126_v51 = vadd.f32 %v5117_v44, %v5111_v24 }
 0x1ce   :  { %v2446_v40 = vpop.f32.mrf.mxu1  ;;  %v2117_v55 = vpop.f32.mrf.mxu0 }
 0x1d3   :  { %v5119_v58 = vpop.f32.mrf.mxu1 }
 0x1d5   :  { %v2451_v60 = vpop.f32.mrf.mxu1 }
 0x1d6   :  { %v2460_v60 = vadd.f32 %v5119_v58, %v2126_v51 }
 0x1da   :  { %v2748_v2 = vpop.f32.mrf.mxu0 }
 0x1db   :  { %v2787_v8 = vadd.f32 %v2748_v2, %v2453_v62 }
 0x1dc   :  { %v2768_v6 = vpop.f32.mrf.mxu1  ;;  %v2750_v47 = vpop.f32.mrf.mxu0 }
 0x1dd   :  { %v2802_v7 = vadd.f32 %v5126_v3, %v2787_v8  ;;  %v2791_v10 = vadd.f32 %v2768_v6, %v2457_v4 }
 0x1de   :  { %v2770_v45 = vpop.f32.mrf.mxu1  ;;  %v2753_v15 = vpop.f32.mrf.mxu0 }
 0x1df   :  { %v2806_v5 = vadd.f32 %v5126_v3, %v2791_v10  ;;  %vm2810_vm7 = vcmp.ge.f32.partialorder %v2802_v7, 0.0  ;;  %v2818_v14 = vmul.f32 0.2, %v2802_v7  ;;  %v2788_v16 = vadd.f32 %v2753_v15, %v2454_v11 }
 0x1e0   :  { %v2755_v20 = vpop.f32.mrf.mxu0  ;;  %v2773_v46 = vpop.f32.mrf.mxu1  ;;  %v3842_v11 = vmov 0  }
 0x1e1   :  { %vm2814_vm8 = vcmp.ge.f32.partialorder %v2806_v5, 0.0  ;;  %v2822_v17 = vmul.f32 0.2, %v2806_v5  ;;  %v2826_v25 = vsel %vm2810_vm7, %v2802_v7, %v2818_v14  ;;  %v2803_v27 = vadd.f32 %v5126_v3, %v2788_v16  ;;  %3441 = vset.pattern.permute.xlu1 %v3842_v11  ;;  %3440 = vset.pattern.permute.xlu0 %v3842_v11 }
 0x1e2   :  { %v2837_v21 = vmul.f32 %v5133_v52, %v2826_v25  ;;  %v2792_v28 = vadd.f32 %v2773_v46, %v2458_v12  ;;  %v2775_v29 = vpop.f32.mrf.mxu1  ;;  %v2758_v1 = vpop.f32.mrf.mxu0  ;;  %v3389_v46 = vld [vmem:[#allocation2] ss:$0 sm:$0xff] }
 0x1e3   :  { %v2830_v23 = vsel %vm2814_vm8, %v2806_v5, %v2822_v17  ;;  %v2789_v34 = vadd.f32 %v2758_v1, %v2455_v30  ;;  %v2819_v36 = vmul.f32 0.2, %v2803_v27  ;;  %vm2811_vm10 = vcmp.ge.f32.partialorder %v2803_v27, 0.0 }
 0x1e4   :  { %v2841_v26 = vmul.f32 %v5133_v52, %v2830_v23  ;;  %2845 = vadd.xlane.f32.xlu0 %v2837_v21  ;;  %v2807_v31 = vadd.f32 %v5126_v3, %v2792_v28  ;;  %v2760_v37 = vpop.f32.mrf.mxu0  ;;  %v2778_v42 = vpop.f32.mrf.mxu1 }
 0x1e5   :  { %v2804_v35 = vadd.f32 %v5126_v3, %v2789_v34  ;;  %v2793_v43 = vadd.f32 %v2778_v42, %v2459_v41  ;;  %v2827_v48 = vsel %vm2811_vm10, %v2803_v27, %v2819_v36 }
 0x1e6   :  { %2853 = vadd.xlane.f32.xlu1 %v2841_v26  ;;  %vm2815_vm9 = vcmp.ge.f32.partialorder %v2807_v31, 0.0  ;;  %v2823_v56 = vmul.f32 0.2, %v2807_v31  ;;  %v2780_v50 = vpop.f32.mrf.mxu1  ;;  %v2838_v63 = vmul.f32 %v2835_v32, %v2827_v48 }
 0x1e7   :  { %vm2812_vm11 = vcmp.ge.f32.partialorder %v2804_v35, 0.0  ;;  %v2820_v49 = vmul.f32 0.2, %v2804_v35  ;;  %v2763_v40 = vpop.f32.mrf.mxu0  ;;  %v2808_v54 = vadd.f32 %v5126_v3, %v2793_v43 }
 0x1e8   :  { %v2831_v18 = vsel %vm2815_vm9, %v2807_v31, %v2823_v56  ;;  %v2790_v55 = vadd.f32 %v2763_v40, %v2456_v19  ;;  %v2783_v62 = vpop.f32.mrf.mxu1 }
 0x1e9   :  { %v2842_v57 = vmul.f32 %v2835_v32, %v2831_v18  ;;  %v2828_v53 = vsel %vm2812_vm11, %v2804_v35, %v2820_v49  ;;  %v2765_v59 = vpop.f32.mrf.mxu0  ;;  %v2794_v38 = vadd.f32 %v2783_v62, %v2460_v60  ;;  %v2824_v24 = vmul.f32 0.2, %v2808_v54 }
 0x1ea   :  { %v2839_v33 = vmul.f32 %v5133_v52, %v2828_v53  ;;  %v2805_v61 = vadd.f32 %v5126_v3, %v2790_v55  ;;  %v2785_v44 = vpop.f32.mrf.mxu1  ;;  %vm2816_vm13 = vcmp.ge.f32.partialorder %v2808_v54, 0.0 }
 0x1eb   :  { %2855 = vadd.xlane.f32.xlu1 %v2842_v57  ;;  %v2809_v2 = vadd.f32 %v5126_v3, %v2794_v38  ;;  %v2832_v47 = vsel %vm2816_vm13, %v2808_v54, %v2824_v24 }
 0x1ec   :  { %2849 = vadd.xlane.f32.xlu0 %v2839_v33  ;;  %vm2813_vm12 = vcmp.ge.f32.partialorder %v2805_v61, 0.0  ;;  %v2821_v0 = vmul.f32 0.2, %v2805_v61  ;;  %v2843_v58 = vmul.f32 %v5133_v52, %v2832_v47 }
 0x1ed   :  { %vm2817_vm14 = vcmp.ge.f32.partialorder %v2809_v2, 0.0  ;;  %v2825_v6 = vmul.f32 0.2, %v2809_v2 }
 0x1ee   :  { %v2829_v4 = vsel %vm2813_vm12, %v2805_v61, %v2821_v0 }
 0x1ef   :  { %2847 = vadd.xlane.f32.xlu1 %v2838_v63  ;;  %v2840_v8 = vmul.f32 %v2835_v32, %v2829_v4  ;;  %v2833_v7 = vsel %vm2817_vm14, %v2809_v2, %v2825_v6  ;;  %v2923_v6 = vlaneseq }
 0x1f0   :  { %v2844_v10 = vmul.f32 %v2835_v32, %v2833_v7 }
 0x1f1   :  { %2851 = vadd.xlane.f32.xlu0 %v2840_v8  ;;  %v2926_v11 = vand.u32 127, %v2923_v6 }
 0x1f3   :  { %2859 = vadd.xlane.f32.xlu1 %v2844_v10 }
 0x1f5   :  { %2857 = vadd.xlane.f32.xlu0 %v2843_v58  ;;  %v2924_v58 = vshrl.u32 %v2923_v6, 7 }
 0x1f7   :  { %vm2927_vm2 = vcmp.eq.s32.totalorder %v2924_v58, %v2926_v11 }
 0x26d   :  { %v2846_v14 = vpop.xlane.xlu0 %2845 }
 0x26f   :  { %v2854_v45 = vpop.xlane.xlu1 %2853 }
 0x274   :  { %v2856_v13 = vpop.xlane.xlu1 %2855 }
 0x275   :  { %v2875_v5 = vadd.f32 %v2856_v13, %v2854_v45  ;;  %v2850_v25 = vpop.xlane.xlu0 %2849 }
 0x277   :  { %v2876_v3 = vrot.slane %v2875_v5, 4 }
 0x278   :  { %v2848_v15 = vpop.xlane.xlu1 %2847 }
 0x279   :  { %v2877_v16 = vadd.f32 %v2876_v3, %v2875_v5  ;;  %v2861_v17 = vadd.f32 %v2848_v15, %v2846_v14 }
 0x27a   :  { %v2852_v26 = vpop.xlane.xlu0 %2851 }
 0x27b   :  { %v2878_v20 = vrot.slane %v2877_v16, 2  ;;  %v2862_v21 = vrot.slane %v2861_v17, 4  ;;  %v2868_v29 = vadd.f32 %v2852_v26, %v2850_v25 }
 0x27c   :  { %v2860_v1 = vpop.xlane.xlu1 %2859 }
 0x27d   :  { %v2879_v22 = vadd.f32 %v2878_v20, %v2877_v16  ;;  %v2863_v12 = vadd.f32 %v2862_v21, %v2861_v17  ;;  %v2869_v31 = vrot.slane %v2868_v29, 4 }
 0x27e   :  { %v2858_v34 = vpop.xlane.xlu0 %2857 }
 0x27f   :  { %v2880_v23 = vrot.slane %v2879_v22, 1  ;;  %v2864_v52 = vrot.slane %v2863_v12, 2  ;;  %v2870_v36 = vadd.f32 %v2869_v31, %v2868_v29  ;;  %v2882_v37 = vadd.f32 %v2860_v1, %v2858_v34 }
 0x281   :  { %v2881_v27 = vadd.f32 %v2880_v23, %v2879_v22  ;;  %v2865_v28 = vadd.f32 %v2864_v52, %v2863_v12  ;;  %v2871_v41 = vrot.slane %v2870_v36, 2  ;;  %v2883_v35 = vrot.slane %v2882_v37, 4 }
 0x283   :  { %v2897_v30 = vadd.f32 %v3389_v46, %v2881_v27  ;;  %v2866_v9 = vrot.slane %v2865_v28, 1  ;;  %v2872_v42 = vadd.f32 %v2871_v41, %v2870_v36  ;;  %v2884_v57 = vadd.f32 %v2883_v35, %v2882_v37 }
 0x285   :  { %v3392_v56 = vmul.f32 -1.442695, %v2897_v30  ;;  %v2867_v32 = vadd.f32 %v2866_v9, %v2865_v28  ;;  %v2873_v43 = vrot.slane %v2872_v42, 1  ;;  %v2885_v48 = vrot.slane %v2884_v57, 2 }
 0x287   :  { %3778 = vpow2.f32 %v3392_v56  ;;  %v2895_v39 = vadd.f32 %v3389_v46, %v2867_v32  ;;  %v2874_v49 = vadd.f32 %v2873_v43, %v2872_v42  ;;  %v2886_v50 = vadd.f32 %v2885_v48, %v2884_v57 }
 0x289   :  { %v3390_v18 = vmul.f32 -1.442695, %v2895_v39  ;;  %v2896_v19 = vadd.f32 %v3389_v46, %v2874_v49  ;;  %v2887_v51 = vrot.slane %v2886_v50, 1 }
 0x28b   :  { %3780 = vpow2.f32 %v3390_v18  ;;  %v3391_v53 = vmul.f32 -1.442695, %v2896_v19  ;;  %v2888_v40 = vadd.f32 %v2887_v51, %v2886_v50 }
 0x28d   :  { %3782 = vpow2.f32 %v3391_v53  ;;  %v2898_v63 = vadd.f32 %v3389_v46, %v2888_v40 }
 0x28f   :  { %v3393_v55 = vmul.f32 -1.442695, %v2898_v63 }
 0x294   :  { %v3779_v33 = vpop.eup %3778 }
 0x295   :  { %v2913_v54 = vadd.f32 1.0, %v3779_v33 }
 0x297   :  { %3784 = vrcp.f32 %v2913_v54 }
 0x298   :  { %v3781_v59 = vpop.eup %3780  ;;  %3786 = vpow2.f32 %v3393_v55 }
 0x299   :  { %v2911_v60 = vadd.f32 1.0, %v3781_v59 }
 0x29a   :  { %v3783_v61 = vpop.eup %3782 }
 0x29b   :  { %3788 = vrcp.f32 %v2911_v60  ;;  %v2912_v62 = vadd.f32 1.0, %v3783_v61 }
 0x29d   :  { %3790 = vrcp.f32 %v2912_v62 }
 0x2a4   :  { %v3785_v38 = vpop.eup %3784 }
 0x2a5   :  { %v3787_v0 = vpop.eup %3786  ;;  %2938 = vperm.xlu1 %3441, %v3785_v38  }
 0x2a6   :  { %v2914_v24 = vadd.f32 1.0, %v3787_v0 }
 0x2a8   :  { %v3789_v44 = vpop.eup %3788  ;;  %3792 = vrcp.f32 %v2914_v24 }
 0x2a9   :  { %2930 = vperm.xlu1 %3441, %v3789_v44  }
 0x2aa   :  { %v3791_v2 = vpop.eup %3790 }
 0x2ab   :  { %2934 = vperm.xlu0 %3440, %v3791_v2  }
 0x2b5   :  { %v3793_v4 = vpop.eup %3792 }
 0x2b6   :  { %2942 = vperm.xlu1 %3441, %v3793_v4  }
 0x320   :  { %v2939_v8 = vpop.permute.xlu1 %2938 }
 0x321   :  { %v2947_v13 = vrot.slane %v2939_v8, 6 }
 0x324   :  { %v2931_v7 = vpop.permute.xlu1 %2930 }
 0x326   :  { %v2935_v47 = vpop.permute.xlu0 %2934 }
 0x327   :  { %v2944_v10 = vrot.slane %v2935_v47, 7 }
 0x329   :  { %v2946_v45 = vsel %vm2945_vm15, %v2944_v10, %v2931_v7 }
 0x32a   :  { %v2949_v3 = vsel %vm2948_vm0, %v2947_v13, %v2946_v45 }
 0x331   :  { %v2943_v5 = vpop.permute.xlu1 %2942 }
 0x332   :  { %v2950_v14 = vrot.slane %v2943_v5, 5 }
 0x334   :  { %v2952_v15 = vsel %vm2951_vm1, %v2950_v14, %v2949_v3 }
 0x335   :  { %v2954_v16 = vsel %vm2927_vm2, %v2952_v15, 0.0 }
 0x336   :  { %v2956_v17 = vsel %vm2955_vm3, %v2954_v16, 0.0 }
 0x337   :  { %v2957_v25 = vrot.slane %v2956_v17, 4 }
 0x339   :  { %v2958_v20 = vadd.f32 %v2957_v25, %v2956_v17 }
 0x33b   :  { %v2959_v21 = vrot.slane %v2958_v20, 2 }
 0x33d   :  { %v2960_v22 = vadd.f32 %v2959_v21, %v2958_v20 }
 0x33f   :  { %v2961_v12 = vrot.slane %v2960_v22, 1 }
 0x341   :  { %v2962_v23 = vadd.f32 %v2961_v12, %v2960_v22 }
 0x343   :  { %2964 = vst.msk [vmem:[#allocation6] sm:$0x1] %vm2963_vm4, %v2962_v23 }
 0x344   :  { %3825 = shalt.err (!%p3822_p9)
}
 0x345   :  { %2974 = dma.vmem_to_hbm [thread:$0]  %s2972_s25, 16, %s5164_s5, [#allocation5]  }
 0x346   :  { %3836 = dma.done.wait [#allocation5], 16  }
 0x347   :  { %3837 = vsyncadd [#allocation5], 4294967280 }
 0x348   :  { %2978 = vsyncpa [#allocation4], 1 }
 0x349   :  { %2979 = vsyncpa [#allocation5], 1 }

</bundles_post_ra>
